<compile_context>
chip_gen: v7x
topology: tpu7x:2x2x1
jax: 0.10.0
libtpu: 0.0.40
codegen_flags: <defaults>
</compile_context>

<pallas_src>
import functools

import jax
import jax.numpy as jnp
from jax.experimental import pallas as pl
from jax.experimental.pallas import tpu as pltpu

# ---------------- model hyper-parameters (small, synthetic) ----------------
BATCH = 2
SEQ_LEN = 8
INPUT_SIZE = 4
HIDDEN_SIZE = 32
OUTPUT_SIZE = 1
NUM_LAYERS = 3

IN_PAD = 8                      # layer-0 feature dim zero-padded to 8 rows
_H = HIDDEN_SIZE
_H4 = 4 * HIDDEN_SIZE           # 128 = one full f32 lane width
OUT_ROWS = 8                    # sublane-full output slab

# Packed-parameter row offsets (all multiples of 8 so in-kernel slices stay
# sublane-tile aligned).  Layers 1/2 store the FUSED [wih; whh] block.
_OFF_WIH0 = 0      # (IN_PAD, 4H)   rows [0, 8)
_OFF_WHH0 = 8      # (H, 4H)        rows [8, 40)
_OFF_B0 = 40       # (1, 4H)        row 40 (segment padded to 8 rows)
_OFF_W1 = 48       # (2H, 4H)       rows [48, 112)   fused [wih1; whh1]
_OFF_B1 = 112      # (1, 4H)
_OFF_W2 = 120      # (2H, 4H)       rows [120, 184)  fused [wih2; whh2]
_OFF_B2 = 184      # (1, 4H)
_OFF_FCW = 192     # (H, 4H)  only column 0 valid
_OFF_FCB = 224     # (1, 4H)  only column 0 valid
_PACK_ROWS = 232


def _lstm_fc_kernel(x_ref, p_ref, out_ref, *, batch, seq_len):
    """3-layer LSTM (PyTorch gate order i,f,g,o) + Linear head.

    x_ref: (T*B, IN_PAD) time-major rows (row = t*B + b), zero-padded features.
    p_ref: (232, 128) packed parameters (i/f/o gate columns pre-scaled by 0.5).
    out_ref: (8, 128) lane-dense output slab; rows [0,B) col 0 = fc result.
    """
    H = _H
    B = batch
    T = seq_len

    # ---- per-lane activation constants (computed once) ----
    # Gates arrive pre-scaled by 0.5 on the i/f/o quarters (folded into the
    # packed weights/biases), so:
    #   sigmoid(orig) = 0.5 * tanh(gate) + 0.5   on i/f/o
    #   tanh(orig)    =       tanh(gate)         on g
    lane = jax.lax.broadcasted_iota(jnp.int32, (1, _H4), 1)
    is_g = jnp.logical_and(lane >= 2 * H, lane < 3 * H)
    scale = jnp.where(is_g, 1.0, 0.5).astype(jnp.float32)   # (1, 4H)
    shift = jnp.where(is_g, 0.0, 0.5).astype(jnp.float32)   # (1, 4H)

    # ---- layer-0 input projection hoisted out of the recurrence ----
    # (weights + bias already carry the 0.5 i/f/o pre-scale)
    x2d = x_ref[...].astype(jnp.float32)                     # (T*B, IN_PAD)
    xproj0 = (jnp.dot(x2d, p_ref[_OFF_WIH0:_OFF_WIH0 + IN_PAD, :],
                      preferred_element_type=jnp.float32)
              + p_ref[_OFF_B0:_OFF_B0 + 1, :])

    # ---- recurrent / fused weights (loop-invariant loads) ----
    whh0 = p_ref[_OFF_WHH0:_OFF_WHH0 + H, :]                 # (H, 4H)
    w1 = p_ref[_OFF_W1:_OFF_W1 + 2 * H, :]                   # (2H, 4H)
    b1 = p_ref[_OFF_B1:_OFF_B1 + 1, :]                       # (1, 4H)
    w2 = p_ref[_OFF_W2:_OFF_W2 + 2 * H, :]                   # (2H, 4H)
    b2 = p_ref[_OFF_B2:_OFF_B2 + 1, :]                       # (1, 4H)

    zeros = jnp.zeros((B, H), jnp.float32)
    h0, c0 = zeros, zeros
    h1, c1 = zeros, zeros
    h2, c2 = zeros, zeros
    h0_hist = []
    h1_hist = []

    # ---- wavefront over the 3 layers: super-step s advances layer0@t=s,
    # layer1@t=s-1, layer2@t=s-2.  All active layers share ONE tanh + one
    # cell-update block per super-step (gates stacked along sublanes). ----
    for s in range(T + NUM_LAYERS - 1):
        t0, t1, t2 = s, s - 1, s - 2
        gate_parts, c_parts, active = [], [], []

        if 0 <= t0 < T:
            g = xproj0[t0 * B:(t0 + 1) * B, :] + jnp.dot(
                h0, whh0, preferred_element_type=jnp.float32)
            gate_parts.append(g); c_parts.append(c0); active.append(0)
        if 0 <= t1 < T:
            lhs = jnp.concatenate([h0_hist[t1], h1], axis=1)   # (B, 2H)
            g = jnp.dot(lhs, w1, preferred_element_type=jnp.float32) + b1
            gate_parts.append(g); c_parts.append(c1); active.append(1)
        if 0 <= t2 < T:
            lhs = jnp.concatenate([h1_hist[t2], h2], axis=1)   # (B, 2H)
            g = jnp.dot(lhs, w2, preferred_element_type=jnp.float32) + b2
            gate_parts.append(g); c_parts.append(c2); active.append(2)

        if len(gate_parts) == 1:
            gates, c_all = gate_parts[0], c_parts[0]
        else:
            gates = jnp.concatenate(gate_parts, axis=0)        # (k*B, 4H)
            c_all = jnp.concatenate(c_parts, axis=0)

        act = jnp.tanh(gates) * scale + shift                  # [i | f | g | o]
        i_g = act[:, 0 * H:1 * H]
        f_g = act[:, 1 * H:2 * H]
        g_g = act[:, 2 * H:3 * H]
        o_g = act[:, 3 * H:4 * H]
        c_new = f_g * c_all + i_g * g_g
        h_new = o_g * jnp.tanh(c_new)

        for idx, layer in enumerate(active):
            hn = h_new[idx * B:(idx + 1) * B, :]
            cn = c_new[idx * B:(idx + 1) * B, :]
            if layer == 0:
                h0, c0 = hn, cn
                h0_hist.append(hn)
            elif layer == 1:
                h1, c1 = hn, cn
                h1_hist.append(hn)
            else:
                h2, c2 = hn, cn

    # ---- fc head on the top layer's last hidden state ----
    # Pad the lhs to a full 8-sublane tile so the final store is an unmasked
    # full-tile vst.  fc weights are NOT gate-scaled.
    out_rows = out_ref.shape[0]
    if out_rows > B:
        h_last = jnp.concatenate(
            [h2, jnp.zeros((out_rows - B, H), jnp.float32)], axis=0)
    else:
        h_last = h2
    fcw = p_ref[_OFF_FCW:_OFF_FCW + H, :]                     # (H, 4H), col 0
    fcb = p_ref[_OFF_FCB:_OFF_FCB + 1, :]                     # (1, 4H), col 0
    out = jnp.dot(h_last, fcw, preferred_element_type=jnp.float32) + fcb
    out_ref[...] = out.astype(out_ref.dtype)


def _pad_rows(a, nrows, ncols=_H4):
    out = jnp.zeros((nrows, ncols), jnp.float32)
    return out.at[: a.shape[0], : a.shape[1]].set(a)


def pack_params(params):
    """Pack all parameters into one (232, 128) f32 buffer (single DMA).

    Called ONCE at init (the result is cached/reused across forward calls).
    The i/f/o gate column blocks of every LSTM weight/bias are pre-scaled by
    0.5 so the kernel's sigmoid-via-tanh needs no per-step pre-multiply
    (exact rescale: 0.5 is a power of two).  Layers 1/2 store fused
    [wih; whh] (64, 128) blocks so the kernel issues one matmul per step.
    """
    H = HIDDEN_SIZE
    lane = jnp.arange(_H4)
    col_scale = jnp.where((lane >= 2 * H) & (lane < 3 * H), 1.0, 0.5
                          ).astype(jnp.float32)               # (4H,)
    segs = [
        _pad_rows(params["wih0"] * col_scale, IN_PAD),        # (4,128)->(8,128)
        params["whh0"] * col_scale,                           # (32,128)
        _pad_rows(params["b0"] * col_scale, 8),               # (1,128)->(8,128)
        jnp.concatenate([params["wih1"], params["whh1"]], axis=0) * col_scale,
        _pad_rows(params["b1"] * col_scale, 8),
        jnp.concatenate([params["wih2"], params["whh2"]], axis=0) * col_scale,
        _pad_rows(params["b2"] * col_scale, 8),
        _pad_rows(params["fcw"], HIDDEN_SIZE),                # (32,1)->(32,128)
        _pad_rows(params["fcb"], 8),                          # (1,1) ->(8,128)
    ]
    packed = jnp.concatenate(segs, axis=0)
    assert packed.shape == (_PACK_ROWS, _H4), packed.shape
    return packed


@jax.jit
def vgd_forward(x, packed):
    """x: (B, T, input_size) f32; packed: (232, 128) from pack_params.

    Jitted as a whole: the tiny layout ops + pallas_call + output slice are
    one device dispatch.
    """
    batch, seq_len, in_size = x.shape
    assert batch <= OUT_ROWS

    # Layout plumbing (fused under jit): time-major rows, zero-pad features.
    xt = jnp.transpose(x, (1, 0, 2)).astype(jnp.float32)      # (T, B, I)
    xt = jnp.pad(xt, ((0, 0), (0, 0), (0, IN_PAD - in_size)))
    x2d = xt.reshape(seq_len * batch, IN_PAD)                 # (T*B, IN_PAD)

    kernel = functools.partial(_lstm_fc_kernel, batch=batch, seq_len=seq_len)
    vmem = pl.BlockSpec(memory_space=pltpu.MemorySpace.VMEM)
    out_full = pl.pallas_call(
        kernel,
        out_shape=jax.ShapeDtypeStruct((OUT_ROWS, _H4), jnp.float32),
        in_specs=[vmem, vmem],
        out_specs=vmem,
    )(x2d, packed)
    return out_full[:batch, :OUTPUT_SIZE]


def init_params(key):
    """Deterministic init, PyTorch-style U(-1/sqrt(H), 1/sqrt(H)).

    Weights are stored pre-transposed ((in_dim, 4H), (H, 4H), (H, out)) and the
    two LSTM biases (b_ih + b_hh) are fused into one (1, 4H) bias per layer.
    Gate order along the 4H axis is PyTorch's: [i, f, g, o].
    """
    H = HIDDEN_SIZE
    bound = 1.0 / (H ** 0.5)
    params = {}
    keys = jax.random.split(key, 4 * NUM_LAYERS + 2)
    kidx = 0
    for l in range(NUM_LAYERS):
        in_dim = INPUT_SIZE if l == 0 else H
        w_ih = jax.random.uniform(keys[kidx], (4 * H, in_dim), jnp.float32,
                                  -bound, bound); kidx += 1
        w_hh = jax.random.uniform(keys[kidx], (4 * H, H), jnp.float32,
                                  -bound, bound); kidx += 1
        b_ih = jax.random.uniform(keys[kidx], (4 * H,), jnp.float32,
                                  -bound, bound); kidx += 1
        b_hh = jax.random.uniform(keys[kidx], (4 * H,), jnp.float32,
                                  -bound, bound); kidx += 1
        params[f"wih{l}"] = w_ih.T                       # (in_dim, 4H)
        params[f"whh{l}"] = w_hh.T                       # (H, 4H)
        params[f"b{l}"] = (b_ih + b_hh).reshape(1, 4 * H)
    fcw = jax.random.uniform(keys[kidx], (OUTPUT_SIZE, H), jnp.float32,
                             -bound, bound); kidx += 1
    fcb = jax.random.uniform(keys[kidx], (OUTPUT_SIZE,), jnp.float32,
                             -bound, bound)
    params["fcw"] = fcw.T                                # (H, out)
    params["fcb"] = fcb.reshape(1, OUTPUT_SIZE)
    return params


def vgd_reference(x, params):
    """Pure-JAX reference of the same stacked-LSTM + fc forward."""
    H = HIDDEN_SIZE
    batch, seq_len, _ = x.shape
    layer_in = x
    h = jnp.zeros((batch, H), jnp.float32)
    for l in range(NUM_LAYERS):
        wih, whh, b = params[f"wih{l}"], params[f"whh{l}"], params[f"b{l}"]
        h = jnp.zeros((batch, H), jnp.float32)
        c = jnp.zeros((batch, H), jnp.float32)
        outs = []
        for t in range(seq_len):
            gates = layer_in[:, t, :] @ wih + h @ whh + b
            i_g = jax.nn.sigmoid(gates[:, 0 * H:1 * H])
            f_g = jax.nn.sigmoid(gates[:, 1 * H:2 * H])
            g_g = jnp.tanh(gates[:, 2 * H:3 * H])
            o_g = jax.nn.sigmoid(gates[:, 3 * H:4 * H])
            c = f_g * c + i_g * g_g
            h = o_g * jnp.tanh(c)
            outs.append(h)
        layer_in = jnp.stack(outs, axis=1)
    return h @ params["fcw"] + params["fcb"]


if __name__ == "__main__":
    key = jax.random.PRNGKey(0)
    pkey, xkey = jax.random.split(key)
    params = init_params(pkey)
    x = jax.random.normal(xkey, (BATCH, SEQ_LEN, INPUT_SIZE), jnp.float32)

    # Pack parameters ONCE at init; the packed buffer is reused every call.
    packed = jax.block_until_ready(pack_params(params))

    out = jax.block_until_ready(vgd_forward(x, packed))
    assert out.shape == (BATCH, OUTPUT_SIZE), out.shape

    ref = jax.block_until_ready(vgd_reference(x, params))
    # Kernel uses the tanh-form sigmoid (with the 0.5 pre-scale folded into the
    # packed weights — an exact rescale) and a hoisted layer-0 projection;
    # allow a slightly looser (but still tight) tolerance than bit-identical.
    assert jnp.allclose(out, ref, atol=5e-4, rtol=5e-4), (out, ref)

    print("KERNEL_OK")
</pallas_src>

<mosaic_0001>
module attributes {stable_mosaic.version = 11 : i64} {
  func.func @_lstm_fc_kernel(%arg0: memref<16x8xf32, #tpu.memory_space<vmem>>, %arg1: memref<232x128xf32, #tpu.memory_space<vmem>>, %arg2: memref<8x128xf32, #tpu.memory_space<vmem>>) attributes {dimension_semantics = [], scalar_prefetch = 0 : i64, scratch_operands = 0 : i64, tpu.core_type = #tpu.core_type<tc>} {
    %0 = tpu.iota {dimensions = array<i32: 1>} : vector<1x128xi32>
    %c64_i32 = arith.constant 64 : i32
    %1 = vector.broadcast %c64_i32 : i32 to vector<1x128xi32>
    %2 = arith.cmpi sge, %0, %1 : vector<1x128xi32>
    %c96_i32 = arith.constant 96 : i32
    %3 = vector.broadcast %c96_i32 : i32 to vector<1x128xi32>
    %4 = arith.cmpi slt, %0, %3 : vector<1x128xi32>
    %5 = arith.andi %2, %4 : vector<1x128xi1>
    %cst = arith.constant 1.000000e+00 : f32
    %cst_0 = arith.constant 5.000000e-01 : f32
    %6 = vector.broadcast %cst : f32 to vector<1x128xf32>
    %7 = vector.broadcast %cst_0 : f32 to vector<1x128xf32>
    %8 = arith.select %5, %6, %7 : vector<1x128xi1>, vector<1x128xf32>
    %cst_1 = arith.constant 0.000000e+00 : f32
    %cst_2 = arith.constant 5.000000e-01 : f32
    %9 = vector.broadcast %cst_1 : f32 to vector<1x128xf32>
    %10 = vector.broadcast %cst_2 : f32 to vector<1x128xf32>
    %11 = arith.select %5, %9, %10 : vector<1x128xi1>, vector<1x128xf32>
    %c0 = arith.constant 0 : index
    %c0_3 = arith.constant 0 : index
    %12 = vector.load %arg0[%c0, %c0_3] : memref<16x8xf32, #tpu.memory_space<vmem>>, vector<16x8xf32>
    %c0_4 = arith.constant 0 : index
    %c0_5 = arith.constant 0 : index
    %13 = vector.load %arg1[%c0_4, %c0_5] : memref<232x128xf32, #tpu.memory_space<vmem>>, vector<8x128xf32>
    %cst_6 = arith.constant dense<0.000000e+00> : vector<16x128xf32>
    %14 = tpu.matmul %12, %13, %cst_6 {dimension_numbers = #tpu.dot_dimension_numbers<[1], [0], [0], [1], [0, 0, 1, 1], [], []>} : vector<16x8xf32>, vector<8x128xf32>, vector<16x128xf32> -> vector<16x128xf32>
    %c40 = arith.constant 40 : index
    %c0_7 = arith.constant 0 : index
    %15 = vector.load %arg1[%c40, %c0_7] : memref<232x128xf32, #tpu.memory_space<vmem>>, vector<1x128xf32>
    %16 = vector.broadcast %15 : vector<1x128xf32> to vector<16x128xf32>
    %17 = arith.addf %14, %16 : vector<16x128xf32>
    %c8 = arith.constant 8 : index
    %c0_8 = arith.constant 0 : index
    %18 = vector.load %arg1[%c8, %c0_8] : memref<232x128xf32, #tpu.memory_space<vmem>>, vector<32x128xf32>
    %c48 = arith.constant 48 : index
    %c0_9 = arith.constant 0 : index
    %19 = vector.load %arg1[%c48, %c0_9] : memref<232x128xf32, #tpu.memory_space<vmem>>, vector<64x128xf32>
    %c112 = arith.constant 112 : index
    %c0_10 = arith.constant 0 : index
    %20 = vector.load %arg1[%c112, %c0_10] : memref<232x128xf32, #tpu.memory_space<vmem>>, vector<1x128xf32>
    %c120 = arith.constant 120 : index
    %c0_11 = arith.constant 0 : index
    %21 = vector.load %arg1[%c120, %c0_11] : memref<232x128xf32, #tpu.memory_space<vmem>>, vector<64x128xf32>
    %c184 = arith.constant 184 : index
    %c0_12 = arith.constant 0 : index
    %22 = vector.load %arg1[%c184, %c0_12] : memref<232x128xf32, #tpu.memory_space<vmem>>, vector<1x128xf32>
    %cst_13 = arith.constant 0.000000e+00 : f32
    %23 = vector.broadcast %cst_13 : f32 to vector<2x32xf32>
    %24 = vector.extract_strided_slice %17 {offsets = [0, 0], sizes = [2, 128], strides = [1, 1]} : vector<16x128xf32> to vector<2x128xf32>
    %cst_14 = arith.constant dense<0.000000e+00> : vector<2x128xf32>
    %25 = tpu.matmul %23, %18, %cst_14 {dimension_numbers = #tpu.dot_dimension_numbers<[1], [0], [0], [1], [0, 0, 1, 1], [], []>} : vector<2x32xf32>, vector<32x128xf32>, vector<2x128xf32> -> vector<2x128xf32>
    %26 = arith.addf %24, %25 : vector<2x128xf32>
    %27 = math.tanh %26 : vector<2x128xf32>
    %28 = vector.broadcast %8 : vector<1x128xf32> to vector<2x128xf32>
    %29 = arith.mulf %27, %28 : vector<2x128xf32>
    %30 = vector.broadcast %11 : vector<1x128xf32> to vector<2x128xf32>
    %31 = arith.addf %29, %30 : vector<2x128xf32>
    %32 = vector.extract_strided_slice %31 {offsets = [0, 0], sizes = [2, 32], strides = [1, 1]} : vector<2x128xf32> to vector<2x32xf32>
    %33 = vector.extract_strided_slice %31 {offsets = [0, 32], sizes = [2, 32], strides = [1, 1]} : vector<2x128xf32> to vector<2x32xf32>
    %34 = vector.extract_strided_slice %31 {offsets = [0, 64], sizes = [2, 32], strides = [1, 1]} : vector<2x128xf32> to vector<2x32xf32>
    %35 = vector.extract_strided_slice %31 {offsets = [0, 96], sizes = [2, 32], strides = [1, 1]} : vector<2x128xf32> to vector<2x32xf32>
    %36 = arith.mulf %33, %23 : vector<2x32xf32>
    %37 = arith.mulf %32, %34 : vector<2x32xf32>
    %38 = arith.addf %36, %37 : vector<2x32xf32>
    %39 = math.tanh %38 : vector<2x32xf32>
    %40 = arith.mulf %35, %39 : vector<2x32xf32>
    %41 = vector.extract_strided_slice %17 {offsets = [2, 0], sizes = [2, 128], strides = [1, 1]} : vector<16x128xf32> to vector<2x128xf32>
    %cst_15 = arith.constant dense<0.000000e+00> : vector<2x128xf32>
    %42 = tpu.matmul %40, %18, %cst_15 {dimension_numbers = #tpu.dot_dimension_numbers<[1], [0], [0], [1], [0, 0, 1, 1], [], []>} : vector<2x32xf32>, vector<32x128xf32>, vector<2x128xf32> -> vector<2x128xf32>
    %43 = arith.addf %41, %42 : vector<2x128xf32>
    %44 = tpu.concatenate %40, %23 in 1 : vector<2x32xf32>, vector<2x32xf32> -> vector<2x64xf32>
    %cst_16 = arith.constant dense<0.000000e+00> : vector<2x128xf32>
    %45 = tpu.matmul %44, %19, %cst_16 {dimension_numbers = #tpu.dot_dimension_numbers<[1], [0], [0], [1], [0, 0, 1, 1], [], []>} : vector<2x64xf32>, vector<64x128xf32>, vector<2x128xf32> -> vector<2x128xf32>
    %46 = vector.broadcast %20 : vector<1x128xf32> to vector<2x128xf32>
    %47 = arith.addf %45, %46 : vector<2x128xf32>
    %48 = tpu.concatenate %43, %47 in 0 : vector<2x128xf32>, vector<2x128xf32> -> vector<4x128xf32>
    %49 = tpu.concatenate %38, %23 in 0 : vector<2x32xf32>, vector<2x32xf32> -> vector<4x32xf32>
    %50 = math.tanh %48 : vector<4x128xf32>
    %51 = vector.broadcast %8 : vector<1x128xf32> to vector<4x128xf32>
    %52 = arith.mulf %50, %51 : vector<4x128xf32>
    %53 = vector.broadcast %11 : vector<1x128xf32> to vector<4x128xf32>
    %54 = arith.addf %52, %53 : vector<4x128xf32>
    %55 = vector.extract_strided_slice %54 {offsets = [0, 0], sizes = [4, 32], strides = [1, 1]} : vector<4x128xf32> to vector<4x32xf32>
    %56 = vector.extract_strided_slice %54 {offsets = [0, 32], sizes = [4, 32], strides = [1, 1]} : vector<4x128xf32> to vector<4x32xf32>
    %57 = vector.extract_strided_slice %54 {offsets = [0, 64], sizes = [4, 32], strides = [1, 1]} : vector<4x128xf32> to vector<4x32xf32>
    %58 = vector.extract_strided_slice %54 {offsets = [0, 96], sizes = [4, 32], strides = [1, 1]} : vector<4x128xf32> to vector<4x32xf32>
    %59 = arith.mulf %56, %49 : vector<4x32xf32>
    %60 = arith.mulf %55, %57 : vector<4x32xf32>
    %61 = arith.addf %59, %60 : vector<4x32xf32>
    %62 = math.tanh %61 : vector<4x32xf32>
    %63 = arith.mulf %58, %62 : vector<4x32xf32>
    %64 = vector.extract_strided_slice %63 {offsets = [0, 0], sizes = [2, 32], strides = [1, 1]} : vector<4x32xf32> to vector<2x32xf32>
    %65 = vector.extract_strided_slice %61 {offsets = [0, 0], sizes = [2, 32], strides = [1, 1]} : vector<4x32xf32> to vector<2x32xf32>
    %66 = vector.extract_strided_slice %63 {offsets = [2, 0], sizes = [2, 32], strides = [1, 1]} : vector<4x32xf32> to vector<2x32xf32>
    %67 = vector.extract_strided_slice %61 {offsets = [2, 0], sizes = [2, 32], strides = [1, 1]} : vector<4x32xf32> to vector<2x32xf32>
    %68 = vector.extract_strided_slice %17 {offsets = [4, 0], sizes = [2, 128], strides = [1, 1]} : vector<16x128xf32> to vector<2x128xf32>
    %cst_17 = arith.constant dense<0.000000e+00> : vector<2x128xf32>
    %69 = tpu.matmul %64, %18, %cst_17 {dimension_numbers = #tpu.dot_dimension_numbers<[1], [0], [0], [1], [0, 0, 1, 1], [], []>} : vector<2x32xf32>, vector<32x128xf32>, vector<2x128xf32> -> vector<2x128xf32>
    %70 = arith.addf %68, %69 : vector<2x128xf32>
    %71 = tpu.concatenate %64, %66 in 1 : vector<2x32xf32>, vector<2x32xf32> -> vector<2x64xf32>
    %cst_18 = arith.constant dense<0.000000e+00> : vector<2x128xf32>
    %72 = tpu.matmul %71, %19, %cst_18 {dimension_numbers = #tpu.dot_dimension_numbers<[1], [0], [0], [1], [0, 0, 1, 1], [], []>} : vector<2x64xf32>, vector<64x128xf32>, vector<2x128xf32> -> vector<2x128xf32>
    %73 = vector.broadcast %20 : vector<1x128xf32> to vector<2x128xf32>
    %74 = arith.addf %72, %73 : vector<2x128xf32>
    %75 = tpu.concatenate %66, %23 in 1 : vector<2x32xf32>, vector<2x32xf32> -> vector<2x64xf32>
    %cst_19 = arith.constant dense<0.000000e+00> : vector<2x128xf32>
    %76 = tpu.matmul %75, %21, %cst_19 {dimension_numbers = #tpu.dot_dimension_numbers<[1], [0], [0], [1], [0, 0, 1, 1], [], []>} : vector<2x64xf32>, vector<64x128xf32>, vector<2x128xf32> -> vector<2x128xf32>
    %77 = vector.broadcast %22 : vector<1x128xf32> to vector<2x128xf32>
    %78 = arith.addf %76, %77 : vector<2x128xf32>
    %79 = tpu.concatenate %70, %74, %78 in 0 : vector<2x128xf32>, vector<2x128xf32>, vector<2x128xf32> -> vector<6x128xf32>
    %80 = tpu.concatenate %65, %67, %23 in 0 : vector<2x32xf32>, vector<2x32xf32>, vector<2x32xf32> -> vector<6x32xf32>
    %81 = math.tanh %79 : vector<6x128xf32>
    %82 = vector.broadcast %8 : vector<1x128xf32> to vector<6x128xf32>
    %83 = arith.mulf %81, %82 : vector<6x128xf32>
    %84 = vector.broadcast %11 : vector<1x128xf32> to vector<6x128xf32>
    %85 = arith.addf %83, %84 : vector<6x128xf32>
    %86 = vector.extract_strided_slice %85 {offsets = [0, 0], sizes = [6, 32], strides = [1, 1]} : vector<6x128xf32> to vector<6x32xf32>
    %87 = vector.extract_strided_slice %85 {offsets = [0, 32], sizes = [6, 32], strides = [1, 1]} : vector<6x128xf32> to vector<6x32xf32>
    %88 = vector.extract_strided_slice %85 {offsets = [0, 64], sizes = [6, 32], strides = [1, 1]} : vector<6x128xf32> to vector<6x32xf32>
    %89 = vector.extract_strided_slice %85 {offsets = [0, 96], sizes = [6, 32], strides = [1, 1]} : vector<6x128xf32> to vector<6x32xf32>
    %90 = arith.mulf %87, %80 : vector<6x32xf32>
    %91 = arith.mulf %86, %88 : vector<6x32xf32>
    %92 = arith.addf %90, %91 : vector<6x32xf32>
    %93 = math.tanh %92 : vector<6x32xf32>
    %94 = arith.mulf %89, %93 : vector<6x32xf32>
    %95 = vector.extract_strided_slice %94 {offsets = [0, 0], sizes = [2, 32], strides = [1, 1]} : vector<6x32xf32> to vector<2x32xf32>
    %96 = vector.extract_strided_slice %92 {offsets = [0, 0], sizes = [2, 32], strides = [1, 1]} : vector<6x32xf32> to vector<2x32xf32>
    %97 = vector.extract_strided_slice %94 {offsets = [2, 0], sizes = [2, 32], strides = [1, 1]} : vector<6x32xf32> to vector<2x32xf32>
    %98 = vector.extract_strided_slice %92 {offsets = [2, 0], sizes = [2, 32], strides = [1, 1]} : vector<6x32xf32> to vector<2x32xf32>
    %99 = vector.extract_strided_slice %94 {offsets = [4, 0], sizes = [2, 32], strides = [1, 1]} : vector<6x32xf32> to vector<2x32xf32>
    %100 = vector.extract_strided_slice %92 {offsets = [4, 0], sizes = [2, 32], strides = [1, 1]} : vector<6x32xf32> to vector<2x32xf32>
    %101 = vector.extract_strided_slice %17 {offsets = [6, 0], sizes = [2, 128], strides = [1, 1]} : vector<16x128xf32> to vector<2x128xf32>
    %cst_20 = arith.constant dense<0.000000e+00> : vector<2x128xf32>
    %102 = tpu.matmul %95, %18, %cst_20 {dimension_numbers = #tpu.dot_dimension_numbers<[1], [0], [0], [1], [0, 0, 1, 1], [], []>} : vector<2x32xf32>, vector<32x128xf32>, vector<2x128xf32> -> vector<2x128xf32>
    %103 = arith.addf %101, %102 : vector<2x128xf32>
    %104 = tpu.concatenate %95, %97 in 1 : vector<2x32xf32>, vector<2x32xf32> -> vector<2x64xf32>
    %cst_21 = arith.constant dense<0.000000e+00> : vector<2x128xf32>
    %105 = tpu.matmul %104, %19, %cst_21 {dimension_numbers = #tpu.dot_dimension_numbers<[1], [0], [0], [1], [0, 0, 1, 1], [], []>} : vector<2x64xf32>, vector<64x128xf32>, vector<2x128xf32> -> vector<2x128xf32>
    %106 = vector.broadcast %20 : vector<1x128xf32> to vector<2x128xf32>
    %107 = arith.addf %105, %106 : vector<2x128xf32>
    %108 = tpu.concatenate %97, %99 in 1 : vector<2x32xf32>, vector<2x32xf32> -> vector<2x64xf32>
    %cst_22 = arith.constant dense<0.000000e+00> : vector<2x128xf32>
    %109 = tpu.matmul %108, %21, %cst_22 {dimension_numbers = #tpu.dot_dimension_numbers<[1], [0], [0], [1], [0, 0, 1, 1], [], []>} : vector<2x64xf32>, vector<64x128xf32>, vector<2x128xf32> -> vector<2x128xf32>
    %110 = vector.broadcast %22 : vector<1x128xf32> to vector<2x128xf32>
    %111 = arith.addf %109, %110 : vector<2x128xf32>
    %112 = tpu.concatenate %103, %107, %111 in 0 : vector<2x128xf32>, vector<2x128xf32>, vector<2x128xf32> -> vector<6x128xf32>
    %113 = tpu.concatenate %96, %98, %100 in 0 : vector<2x32xf32>, vector<2x32xf32>, vector<2x32xf32> -> vector<6x32xf32>
    %114 = math.tanh %112 : vector<6x128xf32>
    %115 = vector.broadcast %8 : vector<1x128xf32> to vector<6x128xf32>
    %116 = arith.mulf %114, %115 : vector<6x128xf32>
    %117 = vector.broadcast %11 : vector<1x128xf32> to vector<6x128xf32>
    %118 = arith.addf %116, %117 : vector<6x128xf32>
    %119 = vector.extract_strided_slice %118 {offsets = [0, 0], sizes = [6, 32], strides = [1, 1]} : vector<6x128xf32> to vector<6x32xf32>
    %120 = vector.extract_strided_slice %118 {offsets = [0, 32], sizes = [6, 32], strides = [1, 1]} : vector<6x128xf32> to vector<6x32xf32>
    %121 = vector.extract_strided_slice %118 {offsets = [0, 64], sizes = [6, 32], strides = [1, 1]} : vector<6x128xf32> to vector<6x32xf32>
    %122 = vector.extract_strided_slice %118 {offsets = [0, 96], sizes = [6, 32], strides = [1, 1]} : vector<6x128xf32> to vector<6x32xf32>
    %123 = arith.mulf %120, %113 : vector<6x32xf32>
    %124 = arith.mulf %119, %121 : vector<6x32xf32>
    %125 = arith.addf %123, %124 : vector<6x32xf32>
    %126 = math.tanh %125 : vector<6x32xf32>
    %127 = arith.mulf %122, %126 : vector<6x32xf32>
    %128 = vector.extract_strided_slice %127 {offsets = [0, 0], sizes = [2, 32], strides = [1, 1]} : vector<6x32xf32> to vector<2x32xf32>
    %129 = vector.extract_strided_slice %125 {offsets = [0, 0], sizes = [2, 32], strides = [1, 1]} : vector<6x32xf32> to vector<2x32xf32>
    %130 = vector.extract_strided_slice %127 {offsets = [2, 0], sizes = [2, 32], strides = [1, 1]} : vector<6x32xf32> to vector<2x32xf32>
    %131 = vector.extract_strided_slice %125 {offsets = [2, 0], sizes = [2, 32], strides = [1, 1]} : vector<6x32xf32> to vector<2x32xf32>
    %132 = vector.extract_strided_slice %127 {offsets = [4, 0], sizes = [2, 32], strides = [1, 1]} : vector<6x32xf32> to vector<2x32xf32>
    %133 = vector.extract_strided_slice %125 {offsets = [4, 0], sizes = [2, 32], strides = [1, 1]} : vector<6x32xf32> to vector<2x32xf32>
    %134 = vector.extract_strided_slice %17 {offsets = [8, 0], sizes = [2, 128], strides = [1, 1]} : vector<16x128xf32> to vector<2x128xf32>
    %cst_23 = arith.constant dense<0.000000e+00> : vector<2x128xf32>
    %135 = tpu.matmul %128, %18, %cst_23 {dimension_numbers = #tpu.dot_dimension_numbers<[1], [0], [0], [1], [0, 0, 1, 1], [], []>} : vector<2x32xf32>, vector<32x128xf32>, vector<2x128xf32> -> vector<2x128xf32>
    %136 = arith.addf %134, %135 : vector<2x128xf32>
    %137 = tpu.concatenate %128, %130 in 1 : vector<2x32xf32>, vector<2x32xf32> -> vector<2x64xf32>
    %cst_24 = arith.constant dense<0.000000e+00> : vector<2x128xf32>
    %138 = tpu.matmul %137, %19, %cst_24 {dimension_numbers = #tpu.dot_dimension_numbers<[1], [0], [0], [1], [0, 0, 1, 1], [], []>} : vector<2x64xf32>, vector<64x128xf32>, vector<2x128xf32> -> vector<2x128xf32>
    %139 = vector.broadcast %20 : vector<1x128xf32> to vector<2x128xf32>
    %140 = arith.addf %138, %139 : vector<2x128xf32>
    %141 = tpu.concatenate %130, %132 in 1 : vector<2x32xf32>, vector<2x32xf32> -> vector<2x64xf32>
    %cst_25 = arith.constant dense<0.000000e+00> : vector<2x128xf32>
    %142 = tpu.matmul %141, %21, %cst_25 {dimension_numbers = #tpu.dot_dimension_numbers<[1], [0], [0], [1], [0, 0, 1, 1], [], []>} : vector<2x64xf32>, vector<64x128xf32>, vector<2x128xf32> -> vector<2x128xf32>
    %143 = vector.broadcast %22 : vector<1x128xf32> to vector<2x128xf32>
    %144 = arith.addf %142, %143 : vector<2x128xf32>
    %145 = tpu.concatenate %136, %140, %144 in 0 : vector<2x128xf32>, vector<2x128xf32>, vector<2x128xf32> -> vector<6x128xf32>
    %146 = tpu.concatenate %129, %131, %133 in 0 : vector<2x32xf32>, vector<2x32xf32>, vector<2x32xf32> -> vector<6x32xf32>
    %147 = math.tanh %145 : vector<6x128xf32>
    %148 = vector.broadcast %8 : vector<1x128xf32> to vector<6x128xf32>
    %149 = arith.mulf %147, %148 : vector<6x128xf32>
    %150 = vector.broadcast %11 : vector<1x128xf32> to vector<6x128xf32>
    %151 = arith.addf %149, %150 : vector<6x128xf32>
    %152 = vector.extract_strided_slice %151 {offsets = [0, 0], sizes = [6, 32], strides = [1, 1]} : vector<6x128xf32> to vector<6x32xf32>
    %153 = vector.extract_strided_slice %151 {offsets = [0, 32], sizes = [6, 32], strides = [1, 1]} : vector<6x128xf32> to vector<6x32xf32>
    %154 = vector.extract_strided_slice %151 {offsets = [0, 64], sizes = [6, 32], strides = [1, 1]} : vector<6x128xf32> to vector<6x32xf32>
    %155 = vector.extract_strided_slice %151 {offsets = [0, 96], sizes = [6, 32], strides = [1, 1]} : vector<6x128xf32> to vector<6x32xf32>
    %156 = arith.mulf %153, %146 : vector<6x32xf32>
    %157 = arith.mulf %152, %154 : vector<6x32xf32>
    %158 = arith.addf %156, %157 : vector<6x32xf32>
    %159 = math.tanh %158 : vector<6x32xf32>
    %160 = arith.mulf %155, %159 : vector<6x32xf32>
    %161 = vector.extract_strided_slice %160 {offsets = [0, 0], sizes = [2, 32], strides = [1, 1]} : vector<6x32xf32> to vector<2x32xf32>
    %162 = vector.extract_strided_slice %158 {offsets = [0, 0], sizes = [2, 32], strides = [1, 1]} : vector<6x32xf32> to vector<2x32xf32>
    %163 = vector.extract_strided_slice %160 {offsets = [2, 0], sizes = [2, 32], strides = [1, 1]} : vector<6x32xf32> to vector<2x32xf32>
    %164 = vector.extract_strided_slice %158 {offsets = [2, 0], sizes = [2, 32], strides = [1, 1]} : vector<6x32xf32> to vector<2x32xf32>
    %165 = vector.extract_strided_slice %160 {offsets = [4, 0], sizes = [2, 32], strides = [1, 1]} : vector<6x32xf32> to vector<2x32xf32>
    %166 = vector.extract_strided_slice %158 {offsets = [4, 0], sizes = [2, 32], strides = [1, 1]} : vector<6x32xf32> to vector<2x32xf32>
    %167 = vector.extract_strided_slice %17 {offsets = [10, 0], sizes = [2, 128], strides = [1, 1]} : vector<16x128xf32> to vector<2x128xf32>
    %cst_26 = arith.constant dense<0.000000e+00> : vector<2x128xf32>
    %168 = tpu.matmul %161, %18, %cst_26 {dimension_numbers = #tpu.dot_dimension_numbers<[1], [0], [0], [1], [0, 0, 1, 1], [], []>} : vector<2x32xf32>, vector<32x128xf32>, vector<2x128xf32> -> vector<2x128xf32>
    %169 = arith.addf %167, %168 : vector<2x128xf32>
    %170 = tpu.concatenate %161, %163 in 1 : vector<2x32xf32>, vector<2x32xf32> -> vector<2x64xf32>
    %cst_27 = arith.constant dense<0.000000e+00> : vector<2x128xf32>
    %171 = tpu.matmul %170, %19, %cst_27 {dimension_numbers = #tpu.dot_dimension_numbers<[1], [0], [0], [1], [0, 0, 1, 1], [], []>} : vector<2x64xf32>, vector<64x128xf32>, vector<2x128xf32> -> vector<2x128xf32>
    %172 = vector.broadcast %20 : vector<1x128xf32> to vector<2x128xf32>
    %173 = arith.addf %171, %172 : vector<2x128xf32>
    %174 = tpu.concatenate %163, %165 in 1 : vector<2x32xf32>, vector<2x32xf32> -> vector<2x64xf32>
    %cst_28 = arith.constant dense<0.000000e+00> : vector<2x128xf32>
    %175 = tpu.matmul %174, %21, %cst_28 {dimension_numbers = #tpu.dot_dimension_numbers<[1], [0], [0], [1], [0, 0, 1, 1], [], []>} : vector<2x64xf32>, vector<64x128xf32>, vector<2x128xf32> -> vector<2x128xf32>
    %176 = vector.broadcast %22 : vector<1x128xf32> to vector<2x128xf32>
    %177 = arith.addf %175, %176 : vector<2x128xf32>
    %178 = tpu.concatenate %169, %173, %177 in 0 : vector<2x128xf32>, vector<2x128xf32>, vector<2x128xf32> -> vector<6x128xf32>
    %179 = tpu.concatenate %162, %164, %166 in 0 : vector<2x32xf32>, vector<2x32xf32>, vector<2x32xf32> -> vector<6x32xf32>
    %180 = math.tanh %178 : vector<6x128xf32>
    %181 = vector.broadcast %8 : vector<1x128xf32> to vector<6x128xf32>
    %182 = arith.mulf %180, %181 : vector<6x128xf32>
    %183 = vector.broadcast %11 : vector<1x128xf32> to vector<6x128xf32>
    %184 = arith.addf %182, %183 : vector<6x128xf32>
    %185 = vector.extract_strided_slice %184 {offsets = [0, 0], sizes = [6, 32], strides = [1, 1]} : vector<6x128xf32> to vector<6x32xf32>
    %186 = vector.extract_strided_slice %184 {offsets = [0, 32], sizes = [6, 32], strides = [1, 1]} : vector<6x128xf32> to vector<6x32xf32>
    %187 = vector.extract_strided_slice %184 {offsets = [0, 64], sizes = [6, 32], strides = [1, 1]} : vector<6x128xf32> to vector<6x32xf32>
    %188 = vector.extract_strided_slice %184 {offsets = [0, 96], sizes = [6, 32], strides = [1, 1]} : vector<6x128xf32> to vector<6x32xf32>
    %189 = arith.mulf %186, %179 : vector<6x32xf32>
    %190 = arith.mulf %185, %187 : vector<6x32xf32>
    %191 = arith.addf %189, %190 : vector<6x32xf32>
    %192 = math.tanh %191 : vector<6x32xf32>
    %193 = arith.mulf %188, %192 : vector<6x32xf32>
    %194 = vector.extract_strided_slice %193 {offsets = [0, 0], sizes = [2, 32], strides = [1, 1]} : vector<6x32xf32> to vector<2x32xf32>
    %195 = vector.extract_strided_slice %191 {offsets = [0, 0], sizes = [2, 32], strides = [1, 1]} : vector<6x32xf32> to vector<2x32xf32>
    %196 = vector.extract_strided_slice %193 {offsets = [2, 0], sizes = [2, 32], strides = [1, 1]} : vector<6x32xf32> to vector<2x32xf32>
    %197 = vector.extract_strided_slice %191 {offsets = [2, 0], sizes = [2, 32], strides = [1, 1]} : vector<6x32xf32> to vector<2x32xf32>
    %198 = vector.extract_strided_slice %193 {offsets = [4, 0], sizes = [2, 32], strides = [1, 1]} : vector<6x32xf32> to vector<2x32xf32>
    %199 = vector.extract_strided_slice %191 {offsets = [4, 0], sizes = [2, 32], strides = [1, 1]} : vector<6x32xf32> to vector<2x32xf32>
    %200 = vector.extract_strided_slice %17 {offsets = [12, 0], sizes = [2, 128], strides = [1, 1]} : vector<16x128xf32> to vector<2x128xf32>
    %cst_29 = arith.constant dense<0.000000e+00> : vector<2x128xf32>
    %201 = tpu.matmul %194, %18, %cst_29 {dimension_numbers = #tpu.dot_dimension_numbers<[1], [0], [0], [1], [0, 0, 1, 1], [], []>} : vector<2x32xf32>, vector<32x128xf32>, vector<2x128xf32> -> vector<2x128xf32>
    %202 = arith.addf %200, %201 : vector<2x128xf32>
    %203 = tpu.concatenate %194, %196 in 1 : vector<2x32xf32>, vector<2x32xf32> -> vector<2x64xf32>
    %cst_30 = arith.constant dense<0.000000e+00> : vector<2x128xf32>
    %204 = tpu.matmul %203, %19, %cst_30 {dimension_numbers = #tpu.dot_dimension_numbers<[1], [0], [0], [1], [0, 0, 1, 1], [], []>} : vector<2x64xf32>, vector<64x128xf32>, vector<2x128xf32> -> vector<2x128xf32>
    %205 = vector.broadcast %20 : vector<1x128xf32> to vector<2x128xf32>
    %206 = arith.addf %204, %205 : vector<2x128xf32>
    %207 = tpu.concatenate %196, %198 in 1 : vector<2x32xf32>, vector<2x32xf32> -> vector<2x64xf32>
    %cst_31 = arith.constant dense<0.000000e+00> : vector<2x128xf32>
    %208 = tpu.matmul %207, %21, %cst_31 {dimension_numbers = #tpu.dot_dimension_numbers<[1], [0], [0], [1], [0, 0, 1, 1], [], []>} : vector<2x64xf32>, vector<64x128xf32>, vector<2x128xf32> -> vector<2x128xf32>
    %209 = vector.broadcast %22 : vector<1x128xf32> to vector<2x128xf32>
    %210 = arith.addf %208, %209 : vector<2x128xf32>
    %211 = tpu.concatenate %202, %206, %210 in 0 : vector<2x128xf32>, vector<2x128xf32>, vector<2x128xf32> -> vector<6x128xf32>
    %212 = tpu.concatenate %195, %197, %199 in 0 : vector<2x32xf32>, vector<2x32xf32>, vector<2x32xf32> -> vector<6x32xf32>
    %213 = math.tanh %211 : vector<6x128xf32>
    %214 = vector.broadcast %8 : vector<1x128xf32> to vector<6x128xf32>
    %215 = arith.mulf %213, %214 : vector<6x128xf32>
    %216 = vector.broadcast %11 : vector<1x128xf32> to vector<6x128xf32>
    %217 = arith.addf %215, %216 : vector<6x128xf32>
    %218 = vector.extract_strided_slice %217 {offsets = [0, 0], sizes = [6, 32], strides = [1, 1]} : vector<6x128xf32> to vector<6x32xf32>
    %219 = vector.extract_strided_slice %217 {offsets = [0, 32], sizes = [6, 32], strides = [1, 1]} : vector<6x128xf32> to vector<6x32xf32>
    %220 = vector.extract_strided_slice %217 {offsets = [0, 64], sizes = [6, 32], strides = [1, 1]} : vector<6x128xf32> to vector<6x32xf32>
    %221 = vector.extract_strided_slice %217 {offsets = [0, 96], sizes = [6, 32], strides = [1, 1]} : vector<6x128xf32> to vector<6x32xf32>
    %222 = arith.mulf %219, %212 : vector<6x32xf32>
    %223 = arith.mulf %218, %220 : vector<6x32xf32>
    %224 = arith.addf %222, %223 : vector<6x32xf32>
    %225 = math.tanh %224 : vector<6x32xf32>
    %226 = arith.mulf %221, %225 : vector<6x32xf32>
    %227 = vector.extract_strided_slice %226 {offsets = [0, 0], sizes = [2, 32], strides = [1, 1]} : vector<6x32xf32> to vector<2x32xf32>
    %228 = vector.extract_strided_slice %224 {offsets = [0, 0], sizes = [2, 32], strides = [1, 1]} : vector<6x32xf32> to vector<2x32xf32>
    %229 = vector.extract_strided_slice %226 {offsets = [2, 0], sizes = [2, 32], strides = [1, 1]} : vector<6x32xf32> to vector<2x32xf32>
    %230 = vector.extract_strided_slice %224 {offsets = [2, 0], sizes = [2, 32], strides = [1, 1]} : vector<6x32xf32> to vector<2x32xf32>
    %231 = vector.extract_strided_slice %226 {offsets = [4, 0], sizes = [2, 32], strides = [1, 1]} : vector<6x32xf32> to vector<2x32xf32>
    %232 = vector.extract_strided_slice %224 {offsets = [4, 0], sizes = [2, 32], strides = [1, 1]} : vector<6x32xf32> to vector<2x32xf32>
    %233 = vector.extract_strided_slice %17 {offsets = [14, 0], sizes = [2, 128], strides = [1, 1]} : vector<16x128xf32> to vector<2x128xf32>
    %cst_32 = arith.constant dense<0.000000e+00> : vector<2x128xf32>
    %234 = tpu.matmul %227, %18, %cst_32 {dimension_numbers = #tpu.dot_dimension_numbers<[1], [0], [0], [1], [0, 0, 1, 1], [], []>} : vector<2x32xf32>, vector<32x128xf32>, vector<2x128xf32> -> vector<2x128xf32>
    %235 = arith.addf %233, %234 : vector<2x128xf32>
    %236 = tpu.concatenate %227, %229 in 1 : vector<2x32xf32>, vector<2x32xf32> -> vector<2x64xf32>
    %cst_33 = arith.constant dense<0.000000e+00> : vector<2x128xf32>
    %237 = tpu.matmul %236, %19, %cst_33 {dimension_numbers = #tpu.dot_dimension_numbers<[1], [0], [0], [1], [0, 0, 1, 1], [], []>} : vector<2x64xf32>, vector<64x128xf32>, vector<2x128xf32> -> vector<2x128xf32>
    %238 = vector.broadcast %20 : vector<1x128xf32> to vector<2x128xf32>
    %239 = arith.addf %237, %238 : vector<2x128xf32>
    %240 = tpu.concatenate %229, %231 in 1 : vector<2x32xf32>, vector<2x32xf32> -> vector<2x64xf32>
    %cst_34 = arith.constant dense<0.000000e+00> : vector<2x128xf32>
    %241 = tpu.matmul %240, %21, %cst_34 {dimension_numbers = #tpu.dot_dimension_numbers<[1], [0], [0], [1], [0, 0, 1, 1], [], []>} : vector<2x64xf32>, vector<64x128xf32>, vector<2x128xf32> -> vector<2x128xf32>
    %242 = vector.broadcast %22 : vector<1x128xf32> to vector<2x128xf32>
    %243 = arith.addf %241, %242 : vector<2x128xf32>
    %244 = tpu.concatenate %235, %239, %243 in 0 : vector<2x128xf32>, vector<2x128xf32>, vector<2x128xf32> -> vector<6x128xf32>
    %245 = tpu.concatenate %228, %230, %232 in 0 : vector<2x32xf32>, vector<2x32xf32>, vector<2x32xf32> -> vector<6x32xf32>
    %246 = math.tanh %244 : vector<6x128xf32>
    %247 = vector.broadcast %8 : vector<1x128xf32> to vector<6x128xf32>
    %248 = arith.mulf %246, %247 : vector<6x128xf32>
    %249 = vector.broadcast %11 : vector<1x128xf32> to vector<6x128xf32>
    %250 = arith.addf %248, %249 : vector<6x128xf32>
    %251 = vector.extract_strided_slice %250 {offsets = [0, 0], sizes = [6, 32], strides = [1, 1]} : vector<6x128xf32> to vector<6x32xf32>
    %252 = vector.extract_strided_slice %250 {offsets = [0, 32], sizes = [6, 32], strides = [1, 1]} : vector<6x128xf32> to vector<6x32xf32>
    %253 = vector.extract_strided_slice %250 {offsets = [0, 64], sizes = [6, 32], strides = [1, 1]} : vector<6x128xf32> to vector<6x32xf32>
    %254 = vector.extract_strided_slice %250 {offsets = [0, 96], sizes = [6, 32], strides = [1, 1]} : vector<6x128xf32> to vector<6x32xf32>
    %255 = arith.mulf %252, %245 : vector<6x32xf32>
    %256 = arith.mulf %251, %253 : vector<6x32xf32>
    %257 = arith.addf %255, %256 : vector<6x32xf32>
    %258 = math.tanh %257 : vector<6x32xf32>
    %259 = arith.mulf %254, %258 : vector<6x32xf32>
    %260 = vector.extract_strided_slice %259 {offsets = [0, 0], sizes = [2, 32], strides = [1, 1]} : vector<6x32xf32> to vector<2x32xf32>
    %261 = vector.extract_strided_slice %259 {offsets = [2, 0], sizes = [2, 32], strides = [1, 1]} : vector<6x32xf32> to vector<2x32xf32>
    %262 = vector.extract_strided_slice %257 {offsets = [2, 0], sizes = [2, 32], strides = [1, 1]} : vector<6x32xf32> to vector<2x32xf32>
    %263 = vector.extract_strided_slice %259 {offsets = [4, 0], sizes = [2, 32], strides = [1, 1]} : vector<6x32xf32> to vector<2x32xf32>
    %264 = vector.extract_strided_slice %257 {offsets = [4, 0], sizes = [2, 32], strides = [1, 1]} : vector<6x32xf32> to vector<2x32xf32>
    %265 = tpu.concatenate %260, %261 in 1 : vector<2x32xf32>, vector<2x32xf32> -> vector<2x64xf32>
    %cst_35 = arith.constant dense<0.000000e+00> : vector<2x128xf32>
    %266 = tpu.matmul %265, %19, %cst_35 {dimension_numbers = #tpu.dot_dimension_numbers<[1], [0], [0], [1], [0, 0, 1, 1], [], []>} : vector<2x64xf32>, vector<64x128xf32>, vector<2x128xf32> -> vector<2x128xf32>
    %267 = vector.broadcast %20 : vector<1x128xf32> to vector<2x128xf32>
    %268 = arith.addf %266, %267 : vector<2x128xf32>
    %269 = tpu.concatenate %261, %263 in 1 : vector<2x32xf32>, vector<2x32xf32> -> vector<2x64xf32>
    %cst_36 = arith.constant dense<0.000000e+00> : vector<2x128xf32>
    %270 = tpu.matmul %269, %21, %cst_36 {dimension_numbers = #tpu.dot_dimension_numbers<[1], [0], [0], [1], [0, 0, 1, 1], [], []>} : vector<2x64xf32>, vector<64x128xf32>, vector<2x128xf32> -> vector<2x128xf32>
    %271 = vector.broadcast %22 : vector<1x128xf32> to vector<2x128xf32>
    %272 = arith.addf %270, %271 : vector<2x128xf32>
    %273 = tpu.concatenate %268, %272 in 0 : vector<2x128xf32>, vector<2x128xf32> -> vector<4x128xf32>
    %274 = tpu.concatenate %262, %264 in 0 : vector<2x32xf32>, vector<2x32xf32> -> vector<4x32xf32>
    %275 = math.tanh %273 : vector<4x128xf32>
    %276 = vector.broadcast %8 : vector<1x128xf32> to vector<4x128xf32>
    %277 = arith.mulf %275, %276 : vector<4x128xf32>
    %278 = vector.broadcast %11 : vector<1x128xf32> to vector<4x128xf32>
    %279 = arith.addf %277, %278 : vector<4x128xf32>
    %280 = vector.extract_strided_slice %279 {offsets = [0, 0], sizes = [4, 32], strides = [1, 1]} : vector<4x128xf32> to vector<4x32xf32>
    %281 = vector.extract_strided_slice %279 {offsets = [0, 32], sizes = [4, 32], strides = [1, 1]} : vector<4x128xf32> to vector<4x32xf32>
    %282 = vector.extract_strided_slice %279 {offsets = [0, 64], sizes = [4, 32], strides = [1, 1]} : vector<4x128xf32> to vector<4x32xf32>
    %283 = vector.extract_strided_slice %279 {offsets = [0, 96], sizes = [4, 32], strides = [1, 1]} : vector<4x128xf32> to vector<4x32xf32>
    %284 = arith.mulf %281, %274 : vector<4x32xf32>
    %285 = arith.mulf %280, %282 : vector<4x32xf32>
    %286 = arith.addf %284, %285 : vector<4x32xf32>
    %287 = math.tanh %286 : vector<4x32xf32>
    %288 = arith.mulf %283, %287 : vector<4x32xf32>
    %289 = vector.extract_strided_slice %288 {offsets = [0, 0], sizes = [2, 32], strides = [1, 1]} : vector<4x32xf32> to vector<2x32xf32>
    %290 = vector.extract_strided_slice %288 {offsets = [2, 0], sizes = [2, 32], strides = [1, 1]} : vector<4x32xf32> to vector<2x32xf32>
    %291 = vector.extract_strided_slice %286 {offsets = [2, 0], sizes = [2, 32], strides = [1, 1]} : vector<4x32xf32> to vector<2x32xf32>
    %292 = tpu.concatenate %289, %290 in 1 : vector<2x32xf32>, vector<2x32xf32> -> vector<2x64xf32>
    %cst_37 = arith.constant dense<0.000000e+00> : vector<2x128xf32>
    %293 = tpu.matmul %292, %21, %cst_37 {dimension_numbers = #tpu.dot_dimension_numbers<[1], [0], [0], [1], [0, 0, 1, 1], [], []>} : vector<2x64xf32>, vector<64x128xf32>, vector<2x128xf32> -> vector<2x128xf32>
    %294 = vector.broadcast %22 : vector<1x128xf32> to vector<2x128xf32>
    %295 = arith.addf %293, %294 : vector<2x128xf32>
    %296 = math.tanh %295 : vector<2x128xf32>
    %297 = vector.broadcast %8 : vector<1x128xf32> to vector<2x128xf32>
    %298 = arith.mulf %296, %297 : vector<2x128xf32>
    %299 = vector.broadcast %11 : vector<1x128xf32> to vector<2x128xf32>
    %300 = arith.addf %298, %299 : vector<2x128xf32>
    %301 = vector.extract_strided_slice %300 {offsets = [0, 0], sizes = [2, 32], strides = [1, 1]} : vector<2x128xf32> to vector<2x32xf32>
    %302 = vector.extract_strided_slice %300 {offsets = [0, 32], sizes = [2, 32], strides = [1, 1]} : vector<2x128xf32> to vector<2x32xf32>
    %303 = vector.extract_strided_slice %300 {offsets = [0, 64], sizes = [2, 32], strides = [1, 1]} : vector<2x128xf32> to vector<2x32xf32>
    %304 = vector.extract_strided_slice %300 {offsets = [0, 96], sizes = [2, 32], strides = [1, 1]} : vector<2x128xf32> to vector<2x32xf32>
    %305 = arith.mulf %302, %291 : vector<2x32xf32>
    %306 = arith.mulf %301, %303 : vector<2x32xf32>
    %307 = arith.addf %305, %306 : vector<2x32xf32>
    %308 = math.tanh %307 : vector<2x32xf32>
    %309 = arith.mulf %304, %308 : vector<2x32xf32>
    %cst_38 = arith.constant 0.000000e+00 : f32
    %310 = vector.broadcast %cst_38 : f32 to vector<6x32xf32>
    %311 = tpu.concatenate %309, %310 in 0 : vector<2x32xf32>, vector<6x32xf32> -> vector<8x32xf32>
    %c192 = arith.constant 192 : index
    %c0_39 = arith.constant 0 : index
    %312 = vector.load %arg1[%c192, %c0_39] : memref<232x128xf32, #tpu.memory_space<vmem>>, vector<32x128xf32>
    %c224 = arith.constant 224 : index
    %c0_40 = arith.constant 0 : index
    %313 = vector.load %arg1[%c224, %c0_40] : memref<232x128xf32, #tpu.memory_space<vmem>>, vector<1x128xf32>
    %cst_41 = arith.constant dense<0.000000e+00> : vector<8x128xf32>
    %314 = tpu.matmul %311, %312, %cst_41 {dimension_numbers = #tpu.dot_dimension_numbers<[1], [0], [0], [1], [0, 0, 1, 1], [], []>} : vector<8x32xf32>, vector<32x128xf32>, vector<8x128xf32> -> vector<8x128xf32>
    %315 = vector.broadcast %313 : vector<1x128xf32> to vector<8x128xf32>
    %316 = arith.addf %314, %315 : vector<8x128xf32>
    %c0_42 = arith.constant 0 : index
    %c0_43 = arith.constant 0 : index
    %317 = vector.load %arg2[%c0_42, %c0_43] : memref<8x128xf32, #tpu.memory_space<vmem>>, vector<8x128xf32>
    tpu.vector_store %arg2[%c0_42, %c0_43], %316 {strides = array<i32>} : memref<8x128xf32, #tpu.memory_space<vmem>>, vector<8x128xf32>,
    return
  }
}

</mosaic_0001>

<bundles_post_ra>
// kernel: vgd_forward.1
= control target key start
LH: loop header
LB: loop body
LE: loop exit
PB: predicated region body
PF: predicated region fallthrough
CT: control target
= control target key end

     0   :  { %7 = vsyncpa [#allocation3], 0  ;;  %s3328_s9 = smov [#allocation2]   ;;  %s3769_s0 = inlined_call_operand.vmem [shape: f32[16,8], index: 0, kind: input, shape index: {}]   ;;  %s3770_s1 = inlined_call_operand.hbm [shape: f32[232,128], index: 1, kind: input, shape index: {}]   ;;  %s3771_s2 = inlined_call_operand.vmem [shape: f32[8,128], index: 2, kind: output, shape index: {}]  }
   0x1   :  { %s15_s10 = sshll.u32 %s3328_s9, 4  ;;  %s3304_s13 = scalar_lea.hbm %s3770_s1, 3712  ;;  %s16_s10 = int_to_ptr.vmem [resolvable:$true] %s15_s10 }
   0x2   :  { %p3305_p0 = scmp.ne.s32.totalorder %s3770_s1, %s3304_s13  ;;  %p3308_p1 = scmp.lt.u32.totalorder %s3304_s13, %s3770_s1 }
   0x4   :  { %p3310_p2 = pnand %p3308_p1, %p3305_p0 }
   0x6   :  { %3313 = shalt.err (!%p3310_p2)
}
   0x7   :  { %s3314_s18 = scalar_lea.vmem %s16_s10, 3712  ;;  %p3319_p4 = scmp.lt.s32.totalorder %s16_s10, %s16_s10 }
   0x8   :  { %p3315_p3 = scmp.ne.s32.totalorder %s16_s10, %s3314_s18  ;;  %p3320_p5 = scmp.lt.s32.totalorder %s3314_s18, %s3314_s18 }
   0xa   :  { %p3321_p6 = por %p3320_p5, %p3319_p4 }
   0xc   :  { %p3322_p7 = pnand %p3321_p6, %p3315_p3 }
   0xe   :  { %3325 = shalt.err (!%p3322_p7)
}
   0xf   :  { %s3329_s19 = smov 128   ;;  %s3330_s20 = smov 8  }
  0x10   :  { %21 = dma.hbm_to_vmem [thread:$0]  %s3770_s1, 3712, %s16_s10, [#allocation3], %s3329_s19, %s3329_s19, %s3330_s20  }
  0x11   :  { %3326 = dma.done.wait [#allocation3], 3712  }
  0x12   :  { %3327 = vsyncadd [#allocation3], 4294963584  ;;  %v3331_v0 = vmov 0.0|0.0   ;;  %vm3332_vm0 = vmmov 0   ;;  %v3333_v1 = vmov 0.0   ;;  %vm40_vm1 = vcmask 64512  }
  0x13   :  { %3009 = vmatprep.subr.bf16.mxu1 %v3331_v0  ;;  %2614 = vmatprep.mubr.msk.f32.mxu1 %vm3332_vm0, %v3333_v1  ;;  %v122_v2 = vld [vmem:[#allocation2 + $0x8] sm:$0xff]  ;;  %v123_v3 = vld [vmem:[#allocation2 + $0x10] sm:$0xff]  ;;  %v34_v4 = vld [vmem:[#allocation2] sm:$0xff]  ;;  %v25_v16 = vlaneseq  ;;  %v3334_v21 = vmov 0.5   ;;  %s3336_s26 = smov 32   ;;  %vm144_vm5 = vcmask 261120  }
  0x14   :  { %v3367_v5 = vpack.c.bf16 %v123_v3, %v122_v2  ;;  %2601 = vmatprep.subr.mxu0 %v34_v4  ;;  %v32_v6 = vld [vmem:[%s3769_s0] sm:$0xff]  ;;  %v33_v7 = vld [vmem:[%s3769_s0 + $0x8] sm:$0xff]  ;;  %v124_v8 = vld [vmem:[#allocation2 + $0x18] sm:$0xff]  ;;  %s3335_s0 = smov 64   ;;  %vm324_vm6 = vcmask 523264   ;;  %vm404_vm7 = vcmask 1041408  }
  0x15   :  { %2602 = vmatpush3.msra.mxu0 %v34_v4  ;;  %2603 = vmatprep.mubr.msk.f32.mxu0 %vm40_vm1, %v32_v6  ;;  %v125_v9 = vld [vmem:[#allocation2 + $0x20] sm:$0xff]  ;;  %v2379_v11 = vld [vmem:[#allocation2 + $0x28] ss:$0 sm:$0xff]  ;;  %v26_v20 = vand.u32 127, %v25_v16  ;;  %v126_v32 = vld [vmem:[#allocation2 + $0x30] sm:$0xff]  ;;  %vm674_vm8 = vcmask 1043456  }
  0x16   :  { %3011 = vmatpush3.bf16.msra.mxu1 %v3367_v5  ;;  %2604 = vmatmul.mubr.msk.f32.vlgmr.msra.gmra.mrb[0].mxu0 %vm40_vm1, %v33_v7  ;;  %v3376_v10 = vpack.c.bf16 %v125_v9, %v124_v8  ;;  %v127_v33 = vld [vmem:[#allocation2 + $0x38] sm:$0xff]  ;;  %v128_v34 = vld [vmem:[#allocation2 + $0x40] sm:$0xff]  ;;  %v129_v36 = vld [vmem:[#allocation2 + $0x48] sm:$0xff] }
  0x17   :  { %3012 = vmatprep.subr.bf16.mxu1 %v3331_v0  ;;  %3015 = vmatprep.subr.bf16.mxu0 %v3331_v0  ;;  %vm27_vm2 = vcmp.ge.s32.totalorder %v26_v20, 64  ;;  %vm28_vm3 = vcmp.lt.s32.totalorder %v26_v20, 96  ;;  %v3404_v35 = vpack.c.bf16 %v127_v33, %v126_v32  ;;  %v3407_v37 = vpack.c.bf16 %v129_v36, %v128_v34  ;;  %v130_v38 = vld [vmem:[#allocation2 + $0x50] sm:$0xff]  ;;  %v131_v39 = vld [vmem:[#allocation2 + $0x58] sm:$0xff]  ;;  %v132_v41 = vld [vmem:[#allocation2 + $0x60] sm:$0xff] }
  0x18   :  { %3017 = vmatpush3.bf16.msra.mxu0 %v3367_v5  ;;  %2625 = vmatprep.mubr.msk.f32.mxu0 %vm3332_vm0, %v3333_v1  ;;  %vm29_vm4 = vmand %vm27_vm2, %vm28_vm3  ;;  %v3411_v40 = vpack.c.bf16 %v131_v39, %v130_v38  ;;  %v133_v42 = vld [vmem:[#allocation2 + $0x68] sm:$0xff]  ;;  %v3433_v49 = vld [vmem:[#allocation2 + $0x70] ss:$0 sm:$0xff] }
  0x19   :  { %3018 = vmatprep.subr.bf16.mxu0 %v3331_v0  ;;  %v3396_v22 = vsel %vm29_vm4, 1.0, %v3334_v21  ;;  %v3398_v24 = vsel %vm29_vm4, 0.0, %v3334_v21  ;;  %v3416_v44 = vpack.c.bf16 %v133_v42, %v132_v41  ;;  %v135_v8 = vld [vmem:[#allocation2 + $0x78] sm:$0xff]  ;;  %v136_v9 = vld [vmem:[#allocation2 + $0x80] sm:$0xff]  ;;  %v141_v21 = vld [vmem:[#allocation2 + $0xa8] sm:$0xff] }
  0x1a   :  { %3014 = vmatpush3.bf16.msra.mxu1 %v3376_v10  ;;  %v3496_v42 = vld [vmem:[#allocation2 + $0xb8] ss:$0 sm:$0xff] }
  0x1b   :  { %3021 = vmatprep.subr.bf16.mxu1 %v3331_v0 }
  0x1c   :  { %3020 = vmatpush3.bf16.msra.mxu0 %v3376_v10 }
  0x1d   :  { %2615 = vmatmul.mubr.f32.vlgmr.msra.gmra.mrb[0].mxu1 %v3333_v1  ;;  %3033 = vmatprep.subr.bf16.mxu0 %v3331_v0 }
  0x1e   :  { %2644 = vmatprep.mubr.msk.f32.mxu1 %vm3332_vm0, %v3333_v1  ;;  %3023 = vmatpush3.bf16.msra.mxu1 %v3404_v35 }
  0x1f   :  { %3024 = vmatprep.subr.bf16.mxu1 %v3331_v0 }
  0x22   :  { %3026 = vmatpush3.bf16.msra.mxu1 %v3407_v37 }
  0x23   :  { %3027 = vmatprep.subr.bf16.mxu1 %v3331_v0 }
  0x26   :  { %3029 = vmatpush3.bf16.msra.mxu1 %v3411_v40 }
  0x27   :  { %3030 = vmatprep.subr.bf16.mxu1 %v3331_v0 }
  0x2a   :  { %3032 = vmatpush3.bf16.msra.mxu1 %v3416_v44 }
  0x2b   :  { %3051 = vmatprep.subr.bf16.mxu1 %v3331_v0 }
  0xe9   :  { %v2605_v12 = vpop.f32.mrb[0].mxu0 }
  0xea   :  { %v3391_v13 = vadd.f32 %v2605_v12, %v2379_v11  ;;  %v113_v14 = vpop.f32.mrb[1].mxu0  ;;  %v3446_v12 = vpack.c.bf16 %v136_v9, %v135_v8 }
  0xeb   :  { %v3393_v15 = vadd.f32 %v2379_v11, %v113_v14  ;;  %v137_v11 = vld [vmem:[#allocation2 + $0x88] sm:$0xff]  ;;  %v138_v14 = vld [vmem:[#allocation2 + $0x90] sm:$0xff] }
  0xec   :  { %v3449_v16 = vpack.c.bf16 %v138_v14, %v137_v11 }
  0xf0   :  { %v214_v17 = vpop.f32.mrb[0].mxu1 }
  0xf1   :  { %v218_v18 = vadd.f32 %v214_v17, %v3393_v15  ;;  %v2616_v19 = vpop.f32.mrb[1].mxu1  ;;  %v139_v17 = vld [vmem:[#allocation2 + $0x98] sm:$0xff] }
  0xf3   :  { %3264 = vtanh.f32 %v218_v18  ;;  %v140_v18 = vld [vmem:[#allocation2 + $0xa0] sm:$0xff] }
  0xf4   :  { %v3453_v19 = vpack.c.bf16 %v140_v18, %v139_v17 }
  0xfd   :  { %v3265_v23 = vpop.eup %3264 }
  0xfe   :  { %v220_v25 = vmul.f32 %v3265_v23, %v3396_v22  ;;  %v142_v23 = vld [vmem:[#allocation2 + $0xb0] sm:$0xff] }
 0x100   :  { %v221_v26 = vadd.f32 %v220_v25, %v3398_v24  ;;  %v3459_v25 = vpack.c.bf16 %v142_v23, %v141_v21 }
 0x102   :  { %224 = vrot.lane.b32.xlu0 %v221_v26, %s3335_s0  ;;  %v222_v29 = vmul.f32 0.0, %v221_v26 }
 0x174   :  { %v225_v27 = vpop.permute.xlu0 %224 }
 0x175   :  { %v227_v28 = vmul.f32 %v225_v27, %v221_v26 }
 0x177   :  { %229 = vrot.lane.b32.xlu0 %v227_v28, %s3336_s26 }
 0x1e9   :  { %v230_v30 = vpop.permute.xlu0 %229 }
 0x1ea   :  { %v232_v31 = vadd.f32 %v230_v30, %v222_v29 }
 0x1ec   :  { %3266 = vtanh.f32 %v232_v31  ;;  %v406_v3 = vsel %vm404_vm7, %v232_v31, 0.0 }
 0x1f6   :  { %v3267_v43 = vpop.eup %3266 }
 0x1f7   :  { %235 = vrot.lane.b32.xlu1 %v3267_v43, %s3335_s0 }
 0x269   :  { %v236_v45 = vpop.permute.xlu1 %235 }
 0x26a   :  { %v238_v46 = vmul.f32 %v236_v45, %v221_v26 }
 0x26c   :  { %240 = vrot.lane.b32.xlu1 %v238_v46, %s3336_s26 }
 0x2de   :  { %v241_v47 = vpop.permute.xlu1 %240 }
 0x2df   :  { %v319_v48 = vsel %vm144_vm5, %v241_v47, 0.0  ;;  %2626 = vmatmul.mubr.msk.f32.vlgmr.msra.gmra.mrb[2].mxu0 %vm144_vm5, %v241_v47 }
 0x2e0   :  { %2645 = vmatmul.mubr.msk.f32.vlgmr.msra.gmra.mrb[2].mxu1 %vm324_vm6, %v319_v48  ;;  %3035 = vmatpush3.bf16.msra.mxu0 %v3367_v5 }
 0x2e1   :  { %3036 = vmatprep.subr.bf16.mxu0 %v3331_v0  ;;  %2655 = vmatprep.mubr.msk.f32.mxu0 %vm3332_vm0, %v3333_v1 }
 0x2e2   :  { %2693 = vmatprep.mubr.msk.f32.mxu1 %vm3332_vm0, %v3333_v1  ;;  %3053 = vmatpush3.bf16.msra.mxu1 %v3446_v12 }
 0x2e3   :  { %3054 = vmatprep.subr.bf16.mxu1 %v3331_v0 }
 0x2e4   :  { %3038 = vmatpush3.bf16.msra.mxu0 %v3376_v10 }
 0x2e5   :  { %3039 = vmatprep.subr.bf16.mxu0 %v3331_v0 }
 0x2e6   :  { %3056 = vmatpush3.bf16.msra.mxu1 %v3449_v16 }
 0x2e7   :  { %3057 = vmatprep.subr.bf16.mxu1 %v3331_v0 }
 0x2ea   :  { %3059 = vmatpush3.bf16.msra.mxu1 %v3453_v19 }
 0x2eb   :  { %3060 = vmatprep.subr.bf16.mxu1 %v3331_v0 }
 0x2ee   :  { %3062 = vmatpush3.bf16.msra.mxu1 %v3459_v25 }
 0x2ef   :  { %3069 = vmatprep.subr.bf16.mxu1 %v3331_v0 }
 0x3b2   :  { %v310_v50 = vpop.f32.mrb[2].mxu0 }
 0x3b3   :  { %v315_v51 = vrot.slane %v310_v50, 6  ;;  %v2627_v52 = vpop.f32.mrb[3].mxu0  ;;  %v394_v53 = vpop.f32.mrb[2].mxu1 }
 0x3b4   :  { %v395_v54 = vadd.f32 %v3433_v49, %v394_v53  ;;  %v2646_v55 = vpop.f32.mrb[3].mxu1 }
 0x3b5   :  { %v317_v56 = vadd.f32 %v315_v51, %v3393_v15 }
 0x3b6   :  { %v402_v57 = vrot.slane %v395_v54, 6 }
 0x3b7   :  { %v399_v58 = vrot.slane %v317_v56, 2 }
 0x3b9   :  { %v405_v59 = vsel %vm404_vm7, %v399_v58, %v402_v57 }
 0x3ba   :  { %3268 = vtanh.f32 %v405_v59 }
 0x3c4   :  { %v3269_v60 = vpop.eup %3268 }
 0x3c5   :  { %v408_v61 = vmul.f32 %v3269_v60, %v3396_v22 }
 0x3c7   :  { %v409_v62 = vadd.f32 %v408_v61, %v3398_v24 }
 0x3c9   :  { %412 = vrot.lane.b32.xlu0 %v409_v62, %s3335_s0  ;;  %v410_v4 = vmul.f32 %v409_v62, %v406_v3 }
 0x43b   :  { %v413_v63 = vpop.permute.xlu0 %412 }
 0x43c   :  { %v415_v2 = vmul.f32 %v413_v63, %v409_v62 }
 0x43e   :  { %417 = vrot.lane.b32.xlu1 %v415_v2, %s3336_s26 }
 0x4b0   :  { %v418_v6 = vpop.permute.xlu1 %417 }
 0x4b1   :  { %v3443_v7 = vadd.f32 %v418_v6, %v410_v4 }
 0x4b3   :  { %3270 = vtanh.f32 %v3443_v7  ;;  %v676_v60 = vsel %vm674_vm8, %v3443_v7, 0.0 }
 0x4bd   :  { %v3271_v20 = vpop.eup %3270 }
 0x4be   :  { %423 = vrot.lane.b32.xlu0 %v3271_v20, %s3335_s0 }
 0x530   :  { %v424_v26 = vpop.permute.xlu0 %423 }
 0x531   :  { %v426_v27 = vmul.f32 %v424_v26, %v409_v62 }
 0x533   :  { %v507_v28 = vrot.slane %v426_v27, 2  ;;  %428 = vrot.lane.b32.xlu1 %v426_v27, %s3336_s26 }
 0x535   :  { %508 = vrot.lane.b32.xlu0 %v507_v28, %s3335_s0 }
 0x5a5   :  { %v429_v29 = vpop.permute.xlu1 %428 }
 0x5a6   :  { %v585_v30 = vsel %vm144_vm5, %v429_v29, 0.0  ;;  %2656 = vmatmul.mubr.msk.f32.vlgmr.msra.gmra.mrb[4].mxu0 %vm144_vm5, %v429_v29 }
 0x5a7   :  { %v591_v31 = vrot.slane %v585_v30, 2  ;;  %3041 = vmatpush3.bf16.msra.mxu0 %v3404_v35  ;;  %2674 = vmatprep.mubr.msk.f32.mxu0 %vm3332_vm0, %v3333_v1  ;;  %v509_v32 = vpop.permute.xlu0 %508 }
 0x5a8   :  { %3042 = vmatprep.subr.bf16.mxu0 %v3331_v0  ;;  %v511_v33 = vsel %vm144_vm5, %v429_v29, %v509_v32 }
 0x5a9   :  { %2694 = vmatmul.mubr.msk.f32.vlgmr.msra.gmra.mrb[4].mxu1 %vm324_vm6, %v591_v31 }
 0x5aa   :  { %3071 = vmatpush3.bf16.msra.mxu1 %v3404_v35  ;;  %2723 = vmatprep.mubr.msk.f32.mxu1 %vm3332_vm0, %v3333_v1 }
 0x5ab   :  { %3044 = vmatpush3.bf16.msra.mxu0 %v3407_v37  ;;  %3072 = vmatprep.subr.bf16.mxu1 %v3331_v0 }
 0x5ac   :  { %3045 = vmatprep.subr.bf16.mxu0 %v3331_v0 }
 0x5ae   :  { %3074 = vmatpush3.bf16.msra.mxu1 %v3407_v37 }
 0x5af   :  { %3047 = vmatpush3.bf16.msra.mxu0 %v3411_v40  ;;  %3075 = vmatprep.subr.bf16.mxu1 %v3331_v0 }
 0x5b0   :  { %3048 = vmatprep.subr.bf16.mxu0 %v3331_v0 }
 0x5b2   :  { %3077 = vmatpush3.bf16.msra.mxu1 %v3411_v40 }
 0x5b3   :  { %3050 = vmatpush3.bf16.msra.mxu0 %v3416_v44  ;;  %3078 = vmatprep.subr.bf16.mxu1 %v3331_v0 }
 0x5b4   :  { %3063 = vmatprep.subr.bf16.mxu0 %v3331_v0 }
 0x5b6   :  { %2675 = vmatmul.mubr.msk.f32.vlgmr.msra.gmra.mrb[6].mxu0 %vm324_vm6, %v511_v33  ;;  %3080 = vmatpush3.bf16.msra.mxu1 %v3416_v44 }
 0x5b7   :  { %3065 = vmatpush3.bf16.msra.mxu0 %v3367_v5  ;;  %2704 = vmatprep.mubr.msk.f32.mxu0 %vm3332_vm0, %v3333_v1 }
 0x5b8   :  { %3066 = vmatprep.subr.bf16.mxu0 %v3331_v0  ;;  %3093 = vmatprep.subr.bf16.mxu1 %v3331_v0 }
 0x5bb   :  { %3068 = vmatpush3.bf16.msra.mxu0 %v3376_v10 }
 0x5bc   :  { %3081 = vmatprep.subr.bf16.mxu0 %v3331_v0 }
 0x679   :  { %v498_v34 = vpop.f32.mrb[4].mxu0 }
 0x67a   :  { %v2657_v36 = vpop.f32.mrb[5].mxu0  ;;  %v503_v41 = vrot.slane %v498_v34, 4 }
 0x67c   :  { %v660_v38 = vpop.f32.mrb[4].mxu1  ;;  %v505_v43 = vadd.f32 %v503_v41, %v3393_v15 }
 0x67d   :  { %v2695_v39 = vpop.f32.mrb[5].mxu1  ;;  %v661_v45 = vadd.f32 %v3496_v42, %v660_v38 }
 0x67e   :  { %v665_v50 = vrot.slane %v505_v43, 4 }
 0x67f   :  { %v671_v52 = vrot.slane %v661_v45, 4 }
 0x689   :  { %v581_v46 = vpop.f32.mrb[6].mxu0 }
 0x68a   :  { %v582_v47 = vadd.f32 %v3433_v49, %v581_v46  ;;  %v2676_v48 = vpop.f32.mrb[7].mxu0 }
 0x68c   :  { %v668_v51 = vrot.slane %v582_v47, 6 }
 0x68e   :  { %v673_v53 = vsel %vm404_vm7, %v665_v50, %v668_v51 }
 0x68f   :  { %v675_v54 = vsel %vm674_vm8, %v673_v53, %v671_v52 }
 0x690   :  { %3272 = vtanh.f32 %v675_v54 }
 0x69a   :  { %v3273_v55 = vpop.eup %3272 }
 0x69b   :  { %v678_v56 = vmul.f32 %v3273_v55, %v3396_v22 }
 0x69d   :  { %v679_v57 = vadd.f32 %v678_v56, %v3398_v24 }
 0x69f   :  { %682 = vrot.lane.b32.xlu1 %v679_v57, %s3335_s0  ;;  %v680_v61 = vmul.f32 %v679_v57, %v676_v60 }
 0x711   :  { %v683_v58 = vpop.permute.xlu1 %682 }
 0x712   :  { %v685_v59 = vmul.f32 %v683_v58, %v679_v57 }
 0x714   :  { %687 = vrot.lane.b32.xlu0 %v685_v59, %s3336_s26 }
 0x786   :  { %v688_v62 = vpop.permute.xlu0 %687 }
 0x787   :  { %v690_v63 = vadd.f32 %v688_v62, %v680_v61 }
 0x789   :  { %3274 = vtanh.f32 %v690_v63 }
 0x793   :  { %v3275_v2 = vpop.eup %3274 }
 0x794   :  { %693 = vrot.lane.b32.xlu1 %v3275_v2, %s3335_s0 }
 0x806   :  { %v694_v3 = vpop.permute.xlu1 %693 }
 0x807   :  { %v696_v4 = vmul.f32 %v694_v3, %v679_v57 }
 0x809   :  { %v777_v6 = vrot.slane %v696_v4, 2  ;;  %698 = vrot.lane.b32.xlu0 %v696_v4, %s3336_s26 }
 0x80b   :  { %778 = vrot.lane.b32.xlu1 %v777_v6, %s3335_s0 }
 0x87b   :  { %v699_v8 = vpop.permute.xlu0 %698 }
 0x87c   :  { %2705 = vmatmul.mubr.msk.f32.vlgmr.msra.gmra.mrb[8].mxu0 %vm144_vm5, %v699_v8 }
 0x87d   :  { %3083 = vmatpush3.bf16.msra.mxu0 %v3446_v12  ;;  %v779_v7 = vpop.permute.xlu1 %778  ;;  %2742 = vmatprep.mubr.msk.f32.mxu0 %vm3332_vm0, %v3333_v1 }
 0x87e   :  { %v781_v9 = vsel %vm144_vm5, %v699_v8, %v779_v7  ;;  %3084 = vmatprep.subr.bf16.mxu0 %v3331_v0 }
 0x87f   :  { %2724 = vmatmul.mubr.msk.f32.vlgmr.msra.gmra.mrb[6].mxu1 %vm324_vm6, %v781_v9  ;;  %v855_v11 = vrot.slane %v781_v9, 2 }
 0x880   :  { %3095 = vmatpush3.bf16.msra.mxu1 %v3367_v5  ;;  %2753 = vmatprep.mubr.msk.f32.mxu1 %vm3332_vm0, %v3333_v1 }
 0x881   :  { %3086 = vmatpush3.bf16.msra.mxu0 %v3449_v16  ;;  %3096 = vmatprep.subr.bf16.mxu1 %v3331_v0 }
 0x882   :  { %3087 = vmatprep.subr.bf16.mxu0 %v3331_v0 }
 0x884   :  { %3098 = vmatpush3.bf16.msra.mxu1 %v3376_v10 }
 0x885   :  { %3089 = vmatpush3.bf16.msra.mxu0 %v3453_v19  ;;  %3111 = vmatprep.subr.bf16.mxu1 %v3331_v0 }
 0x886   :  { %3090 = vmatprep.subr.bf16.mxu0 %v3331_v0 }
 0x889   :  { %3092 = vmatpush3.bf16.msra.mxu0 %v3459_v25 }
 0x88a   :  { %3099 = vmatprep.subr.bf16.mxu0 %v3331_v0 }
 0x88c   :  { %2743 = vmatmul.mubr.msk.f32.vlgmr.msra.gmra.mrb[10].mxu0 %vm324_vm6, %v855_v11 }
 0x88d   :  { %3101 = vmatpush3.bf16.msra.mxu0 %v3404_v35  ;;  %2772 = vmatprep.mubr.msk.f32.mxu0 %vm3332_vm0, %v3333_v1 }
 0x88e   :  { %3102 = vmatprep.subr.bf16.mxu0 %v3331_v0 }
 0x891   :  { %3104 = vmatpush3.bf16.msra.mxu0 %v3407_v37 }
 0x892   :  { %3105 = vmatprep.subr.bf16.mxu0 %v3331_v0 }
 0x895   :  { %3107 = vmatpush3.bf16.msra.mxu0 %v3411_v40 }
 0x896   :  { %3108 = vmatprep.subr.bf16.mxu0 %v3331_v0 }
 0x899   :  { %3110 = vmatpush3.bf16.msra.mxu0 %v3416_v44 }
 0x89a   :  { %3123 = vmatprep.subr.bf16.mxu0 %v3331_v0 }
 0x94f   :  { %v768_v14 = vpop.f32.mrb[8].mxu0 }
 0x950   :  { %v773_v17 = vrot.slane %v768_v14, 2  ;;  %v2706_v18 = vpop.f32.mrb[9].mxu0 }
 0x952   :  { %v775_v20 = vadd.f32 %v773_v17, %v3393_v15  ;;  %v851_v21 = vpop.f32.mrb[6].mxu1 }
 0x953   :  { %v852_v23 = vadd.f32 %v3433_v49, %v851_v21  ;;  %v2725_v26 = vpop.f32.mrb[7].mxu1 }
 0x954   :  { %v929_v27 = vrot.slane %v775_v20, 6 }
 0x955   :  { %v932_v28 = vrot.slane %v852_v23, 6 }
 0x957   :  { %v937_v29 = vsel %vm404_vm7, %v929_v27, %v932_v28 }
 0x95f   :  { %v924_v30 = vpop.f32.mrb[10].mxu0 }
 0x960   :  { %v925_v31 = vadd.f32 %v3496_v42, %v924_v30  ;;  %v2744_v32 = vpop.f32.mrb[11].mxu0 }
 0x962   :  { %v935_v33 = vrot.slane %v925_v31, 4 }
 0x964   :  { %v938_v34 = vsel %vm674_vm8, %v937_v29, %v935_v33 }
 0x965   :  { %3276 = vtanh.f32 %v938_v34 }
 0x96f   :  { %v3277_v36 = vpop.eup %3276 }
 0x970   :  { %v940_v38 = vmul.f32 %v3277_v36, %v3396_v22 }
 0x972   :  { %v941_v15 = vadd.f32 %v940_v38, %v3398_v24 }
 0x974   :  { %944 = vrot.lane.b32.xlu0 %v941_v15, %s3335_s0  ;;  %v942_v43 = vmul.f32 %v941_v15, %v690_v63 }
 0x9e6   :  { %v945_v39 = vpop.permute.xlu0 %944 }
 0x9e7   :  { %v947_v41 = vmul.f32 %v945_v39, %v941_v15 }
 0x9e9   :  { %949 = vrot.lane.b32.xlu1 %v947_v41, %s3336_s26 }
 0xa5b   :  { %v950_v45 = vpop.permute.xlu1 %949 }
 0xa5c   :  { %v952_v46 = vadd.f32 %v950_v45, %v942_v43 }
 0xa5e   :  { %3278 = vtanh.f32 %v952_v46 }
 0xa68   :  { %v3279_v47 = vpop.eup %3278 }
 0xa69   :  { %955 = vrot.lane.b32.xlu0 %v3279_v47, %s3335_s0 }
 0xadb   :  { %v956_v48 = vpop.permute.xlu0 %955 }
 0xadc   :  { %v958_v50 = vmul.f32 %v956_v48, %v941_v15 }
 0xade   :  { %v1036_v51 = vrot.slane %v958_v50, 2  ;;  %960 = vrot.lane.b32.xlu1 %v958_v50, %s3336_s26 }
 0xae0   :  { %1037 = vrot.lane.b32.xlu0 %v1036_v51, %s3335_s0 }
 0xb50   :  { %v961_v52 = vpop.permute.xlu1 %960 }
 0xb51   :  { %2754 = vmatmul.mubr.msk.f32.vlgmr.msra.gmra.mrb[8].mxu1 %vm144_vm5, %v961_v52 }
 0xb52   :  { %3113 = vmatpush3.bf16.msra.mxu1 %v3446_v12  ;;  %v1038_v53 = vpop.permute.xlu0 %1037  ;;  %2791 = vmatprep.mubr.msk.f32.mxu1 %vm3332_vm0, %v3333_v1 }
 0xb53   :  { %v1040_v54 = vsel %vm144_vm5, %v961_v52, %v1038_v53  ;;  %3114 = vmatprep.subr.bf16.mxu1 %v3331_v0 }
 0xb54   :  { %2773 = vmatmul.mubr.msk.f32.vlgmr.msra.gmra.mrb[12].mxu0 %vm324_vm6, %v1040_v54  ;;  %v1114_v55 = vrot.slane %v1040_v54, 2 }
 0xb55   :  { %3125 = vmatpush3.bf16.msra.mxu0 %v3367_v5  ;;  %2802 = vmatprep.mubr.msk.f32.mxu0 %vm3332_vm0, %v3333_v1 }
 0xb56   :  { %3116 = vmatpush3.bf16.msra.mxu1 %v3449_v16  ;;  %3126 = vmatprep.subr.bf16.mxu0 %v3331_v0 }
 0xb57   :  { %3117 = vmatprep.subr.bf16.mxu1 %v3331_v0 }
 0xb59   :  { %3128 = vmatpush3.bf16.msra.mxu0 %v3376_v10 }
 0xb5a   :  { %3119 = vmatpush3.bf16.msra.mxu1 %v3453_v19  ;;  %3141 = vmatprep.subr.bf16.mxu0 %v3331_v0 }
 0xb5b   :  { %3120 = vmatprep.subr.bf16.mxu1 %v3331_v0 }
 0xb5e   :  { %3122 = vmatpush3.bf16.msra.mxu1 %v3459_v25 }
 0xb5f   :  { %3129 = vmatprep.subr.bf16.mxu1 %v3331_v0 }
 0xb61   :  { %2792 = vmatmul.mubr.msk.f32.vlgmr.msra.gmra.mrb[10].mxu1 %vm324_vm6, %v1114_v55 }
 0xb62   :  { %3131 = vmatpush3.bf16.msra.mxu1 %v3404_v35  ;;  %2821 = vmatprep.mubr.msk.f32.mxu1 %vm3332_vm0, %v3333_v1 }
 0xb63   :  { %3132 = vmatprep.subr.bf16.mxu1 %v3331_v0 }
 0xb66   :  { %3134 = vmatpush3.bf16.msra.mxu1 %v3407_v37 }
 0xb67   :  { %3135 = vmatprep.subr.bf16.mxu1 %v3331_v0 }
 0xb6a   :  { %3137 = vmatpush3.bf16.msra.mxu1 %v3411_v40 }
 0xb6b   :  { %3138 = vmatprep.subr.bf16.mxu1 %v3331_v0 }
 0xb6e   :  { %3140 = vmatpush3.bf16.msra.mxu1 %v3416_v44 }
 0xb6f   :  { %3153 = vmatprep.subr.bf16.mxu1 %v3331_v0 }
 0xc24   :  { %v1030_v56 = vpop.f32.mrb[8].mxu1 }
 0xc25   :  { %v2755_v57 = vpop.f32.mrb[9].mxu1  ;;  %v1034_v61 = vadd.f32 %v1030_v56, %v3391_v13 }
 0xc27   :  { %v1110_v58 = vpop.f32.mrb[12].mxu0 }
 0xc28   :  { %v1111_v59 = vadd.f32 %v3433_v49, %v1110_v58  ;;  %v2774_v60 = vpop.f32.mrb[13].mxu0 }
 0xc2a   :  { %v1188_v62 = vrot.slane %v1111_v59, 6 }
 0xc2c   :  { %v1193_v63 = vsel %vm404_vm7, %v1034_v61, %v1188_v62 }
 0xc34   :  { %v1183_v2 = vpop.f32.mrb[10].mxu1 }
 0xc35   :  { %v1184_v3 = vadd.f32 %v3496_v42, %v1183_v2  ;;  %v2793_v4 = vpop.f32.mrb[11].mxu1 }
 0xc37   :  { %v1191_v6 = vrot.slane %v1184_v3, 4 }
 0xc39   :  { %v1194_v8 = vsel %vm674_vm8, %v1193_v63, %v1191_v6 }
 0xc3a   :  { %3280 = vtanh.f32 %v1194_v8 }
 0xc44   :  { %v3281_v7 = vpop.eup %3280 }
 0xc45   :  { %v1196_v9 = vmul.f32 %v3281_v7, %v3396_v22 }
 0xc47   :  { %v1197_v11 = vadd.f32 %v1196_v9, %v3398_v24 }
 0xc49   :  { %1200 = vrot.lane.b32.xlu1 %v1197_v11, %s3335_s0  ;;  %v1198_v18 = vmul.f32 %v1197_v11, %v952_v46 }
 0xcbb   :  { %v1201_v14 = vpop.permute.xlu1 %1200 }
 0xcbc   :  { %v1203_v17 = vmul.f32 %v1201_v14, %v1197_v11 }
 0xcbe   :  { %1205 = vrot.lane.b32.xlu0 %v1203_v17, %s3336_s26 }
 0xd30   :  { %v1206_v20 = vpop.permute.xlu0 %1205 }
 0xd31   :  { %v1208_v21 = vadd.f32 %v1206_v20, %v1198_v18 }
 0xd33   :  { %3282 = vtanh.f32 %v1208_v21 }
 0xd3d   :  { %v3283_v23 = vpop.eup %3282 }
 0xd3e   :  { %1211 = vrot.lane.b32.xlu1 %v3283_v23, %s3335_s0 }
 0xdb0   :  { %v1212_v26 = vpop.permute.xlu1 %1211 }
 0xdb1   :  { %v1214_v27 = vmul.f32 %v1212_v26, %v1197_v11 }
 0xdb3   :  { %v1295_v28 = vrot.slane %v1214_v27, 2  ;;  %1216 = vrot.lane.b32.xlu0 %v1214_v27, %s3336_s26 }
 0xdb5   :  { %1296 = vrot.lane.b32.xlu1 %v1295_v28, %s3335_s0 }
 0xe25   :  { %v1217_v29 = vpop.permute.xlu0 %1216 }
 0xe26   :  { %2803 = vmatmul.mubr.msk.f32.vlgmr.msra.gmra.mrb[14].mxu0 %vm144_vm5, %v1217_v29 }
 0xe27   :  { %3143 = vmatpush3.bf16.msra.mxu0 %v3446_v12  ;;  %v1297_v30 = vpop.permute.xlu1 %1296  ;;  %2840 = vmatprep.mubr.msk.f32.mxu0 %vm3332_vm0, %v3333_v1 }
 0xe28   :  { %v1299_v31 = vsel %vm144_vm5, %v1217_v29, %v1297_v30  ;;  %3144 = vmatprep.subr.bf16.mxu0 %v3331_v0 }
 0xe29   :  { %2822 = vmatmul.mubr.msk.f32.vlgmr.msra.gmra.mrb[12].mxu1 %vm324_vm6, %v1299_v31  ;;  %v1373_v32 = vrot.slane %v1299_v31, 2 }
 0xe2a   :  { %3155 = vmatpush3.bf16.msra.mxu1 %v3367_v5  ;;  %2851 = vmatprep.mubr.msk.f32.mxu1 %vm3332_vm0, %v3333_v1 }
 0xe2b   :  { %3146 = vmatpush3.bf16.msra.mxu0 %v3449_v16  ;;  %3156 = vmatprep.subr.bf16.mxu1 %v3331_v0 }
 0xe2c   :  { %3147 = vmatprep.subr.bf16.mxu0 %v3331_v0 }
 0xe2e   :  { %3158 = vmatpush3.bf16.msra.mxu1 %v3376_v10 }
 0xe2f   :  { %3149 = vmatpush3.bf16.msra.mxu0 %v3453_v19  ;;  %3171 = vmatprep.subr.bf16.mxu1 %v3331_v0 }
 0xe30   :  { %3150 = vmatprep.subr.bf16.mxu0 %v3331_v0 }
 0xe33   :  { %3152 = vmatpush3.bf16.msra.mxu0 %v3459_v25 }
 0xe34   :  { %3159 = vmatprep.subr.bf16.mxu0 %v3331_v0 }
 0xe36   :  { %2841 = vmatmul.mubr.msk.f32.vlgmr.msra.gmra.mrb[16].mxu0 %vm324_vm6, %v1373_v32 }
 0xe37   :  { %3161 = vmatpush3.bf16.msra.mxu0 %v3404_v35  ;;  %2870 = vmatprep.mubr.msk.f32.mxu0 %vm3332_vm0, %v3333_v1 }
 0xe38   :  { %3162 = vmatprep.subr.bf16.mxu0 %v3331_v0 }
 0xe3b   :  { %3164 = vmatpush3.bf16.msra.mxu0 %v3407_v37 }
 0xe3c   :  { %3165 = vmatprep.subr.bf16.mxu0 %v3331_v0 }
 0xe3f   :  { %3167 = vmatpush3.bf16.msra.mxu0 %v3411_v40 }
 0xe40   :  { %3168 = vmatprep.subr.bf16.mxu0 %v3331_v0 }
 0xe43   :  { %3170 = vmatpush3.bf16.msra.mxu0 %v3416_v44 }
 0xe44   :  { %3183 = vmatprep.subr.bf16.mxu0 %v3331_v0 }
 0xef9   :  { %v1286_v33 = vpop.f32.mrb[14].mxu0 }
 0xefa   :  { %v1291_v34 = vrot.slane %v1286_v33, 6  ;;  %v2804_v36 = vpop.f32.mrb[15].mxu0 }
 0xefc   :  { %v1293_v38 = vadd.f32 %v1291_v34, %v3391_v13  ;;  %v1369_v15 = vpop.f32.mrb[12].mxu1 }
 0xefd   :  { %v1370_v39 = vadd.f32 %v3433_v49, %v1369_v15  ;;  %v2823_v41 = vpop.f32.mrb[13].mxu1 }
 0xefe   :  { %v1447_v43 = vrot.slane %v1293_v38, 2 }
 0xeff   :  { %v1450_v45 = vrot.slane %v1370_v39, 6 }
 0xf01   :  { %v1455_v46 = vsel %vm404_vm7, %v1447_v43, %v1450_v45 }
 0xf09   :  { %v1442_v47 = vpop.f32.mrb[16].mxu0 }
 0xf0a   :  { %v1443_v48 = vadd.f32 %v3496_v42, %v1442_v47  ;;  %v2842_v50 = vpop.f32.mrb[17].mxu0 }
 0xf0c   :  { %v1453_v51 = vrot.slane %v1443_v48, 4 }
 0xf0e   :  { %v1456_v52 = vsel %vm674_vm8, %v1455_v46, %v1453_v51 }
 0xf0f   :  { %3284 = vtanh.f32 %v1456_v52 }
 0xf19   :  { %v3285_v53 = vpop.eup %3284 }
 0xf1a   :  { %v1458_v54 = vmul.f32 %v3285_v53, %v3396_v22 }
 0xf1c   :  { %v1459_v55 = vadd.f32 %v1458_v54, %v3398_v24 }
 0xf1e   :  { %1462 = vrot.lane.b32.xlu0 %v1459_v55, %s3335_s0  ;;  %v1460_v58 = vmul.f32 %v1459_v55, %v1208_v21 }
 0xf90   :  { %v1463_v56 = vpop.permute.xlu0 %1462 }
 0xf91   :  { %v1465_v57 = vmul.f32 %v1463_v56, %v1459_v55 }
 0xf93   :  { %1467 = vrot.lane.b32.xlu1 %v1465_v57, %s3336_s26 }
0x1005   :  { %v1468_v59 = vpop.permute.xlu1 %1467 }
0x1006   :  { %v1470_v60 = vadd.f32 %v1468_v59, %v1460_v58 }
0x1008   :  { %3286 = vtanh.f32 %v1470_v60 }
0x1012   :  { %v3287_v61 = vpop.eup %3286 }
0x1013   :  { %1473 = vrot.lane.b32.xlu0 %v3287_v61, %s3335_s0 }
0x1085   :  { %v1474_v62 = vpop.permute.xlu0 %1473 }
0x1086   :  { %v1476_v63 = vmul.f32 %v1474_v62, %v1459_v55 }
0x1088   :  { %v1557_v2 = vrot.slane %v1476_v63, 2  ;;  %1478 = vrot.lane.b32.xlu1 %v1476_v63, %s3336_s26 }
0x108a   :  { %1558 = vrot.lane.b32.xlu0 %v1557_v2, %s3335_s0 }
0x10fa   :  { %v1479_v3 = vpop.permute.xlu1 %1478 }
0x10fb   :  { %2852 = vmatmul.mubr.msk.f32.vlgmr.msra.gmra.mrb[14].mxu1 %vm144_vm5, %v1479_v3 }
0x10fc   :  { %3173 = vmatpush3.bf16.msra.mxu1 %v3446_v12  ;;  %v1559_v4 = vpop.permute.xlu0 %1558  ;;  %2889 = vmatprep.mubr.msk.f32.mxu1 %vm3332_vm0, %v3333_v1 }
0x10fd   :  { %v1561_v6 = vsel %vm144_vm5, %v1479_v3, %v1559_v4  ;;  %3174 = vmatprep.subr.bf16.mxu1 %v3331_v0 }
0x10fe   :  { %2871 = vmatmul.mubr.msk.f32.vlgmr.msra.gmra.mrb[18].mxu0 %vm324_vm6, %v1561_v6 }
0x10ff   :  { %3185 = vmatpush3.bf16.msra.mxu0 %v3367_v5  ;;  %2900 = vmatprep.mubr.msk.f32.mxu0 %vm3332_vm0, %v3333_v1  ;;  %v1635_v5 = vrot.slane %v1561_v6, 2 }
0x1100   :  { %3176 = vmatpush3.bf16.msra.mxu1 %v3449_v16  ;;  %3186 = vmatprep.subr.bf16.mxu0 %v3331_v0 }
0x1101   :  { %3177 = vmatprep.subr.bf16.mxu1 %v3331_v0 }
0x1103   :  { %3188 = vmatpush3.bf16.msra.mxu0 %v3376_v10 }
0x1104   :  { %3179 = vmatpush3.bf16.msra.mxu1 %v3453_v19  ;;  %3201 = vmatprep.subr.bf16.mxu0 %v3331_v0 }
0x1105   :  { %3180 = vmatprep.subr.bf16.mxu1 %v3331_v0 }
0x1108   :  { %3182 = vmatpush3.bf16.msra.mxu1 %v3459_v25 }
0x1109   :  { %3189 = vmatprep.subr.bf16.mxu1 %v3331_v0 }
0x110b   :  { %2890 = vmatmul.mubr.msk.f32.vlgmr.msra.gmra.mrb[16].mxu1 %vm324_vm6, %v1635_v5 }
0x110c   :  { %3191 = vmatpush3.bf16.msra.mxu1 %v3404_v35  ;;  %2919 = vmatprep.mubr.msk.f32.mxu1 %vm3332_vm0, %v3333_v1 }
0x110d   :  { %3192 = vmatprep.subr.bf16.mxu1 %v3331_v0 }
0x1110   :  { %3194 = vmatpush3.bf16.msra.mxu1 %v3407_v37 }
0x1111   :  { %3195 = vmatprep.subr.bf16.mxu1 %v3331_v0 }
0x1114   :  { %3197 = vmatpush3.bf16.msra.mxu1 %v3411_v40 }
0x1115   :  { %3198 = vmatprep.subr.bf16.mxu1 %v3331_v0 }
0x1118   :  { %3200 = vmatpush3.bf16.msra.mxu1 %v3416_v44 }
0x1119   :  { %3213 = vmatprep.subr.bf16.mxu1 %v3331_v0 }
0x11ce   :  { %v1548_v10 = vpop.f32.mrb[14].mxu1 }
0x11cf   :  { %v1553_v8 = vrot.slane %v1548_v10, 4  ;;  %v2853_v7 = vpop.f32.mrb[15].mxu1 }
0x11d1   :  { %v1555_v9 = vadd.f32 %v1553_v8, %v3391_v13  ;;  %v1631_v11 = vpop.f32.mrb[18].mxu0 }
0x11d2   :  { %v1632_v14 = vadd.f32 %v3433_v49, %v1631_v11  ;;  %v2872_v17 = vpop.f32.mrb[19].mxu0 }
0x11d3   :  { %v1709_v18 = vrot.slane %v1555_v9, 4 }
0x11d4   :  { %v1712_v20 = vrot.slane %v1632_v14, 6 }
0x11d6   :  { %v1717_v21 = vsel %vm404_vm7, %v1709_v18, %v1712_v20 }
0x11de   :  { %v1704_v23 = vpop.f32.mrb[16].mxu1 }
0x11df   :  { %v1705_v26 = vadd.f32 %v3496_v42, %v1704_v23  ;;  %v2891_v27 = vpop.f32.mrb[17].mxu1 }
0x11e1   :  { %v1715_v28 = vrot.slane %v1705_v26, 4 }
0x11e3   :  { %v1718_v29 = vsel %vm674_vm8, %v1717_v21, %v1715_v28 }
0x11e4   :  { %3288 = vtanh.f32 %v1718_v29 }
0x11ee   :  { %v3289_v30 = vpop.eup %3288 }
0x11ef   :  { %v1720_v31 = vmul.f32 %v3289_v30, %v3396_v22 }
0x11f1   :  { %v1721_v32 = vadd.f32 %v1720_v31, %v3398_v24 }
0x11f3   :  { %1724 = vrot.lane.b32.xlu1 %v1721_v32, %s3335_s0  ;;  %v1722_v36 = vmul.f32 %v1721_v32, %v1470_v60 }
0x1265   :  { %v1725_v33 = vpop.permute.xlu1 %1724 }
0x1266   :  { %v1727_v34 = vmul.f32 %v1725_v33, %v1721_v32 }
0x1268   :  { %1729 = vrot.lane.b32.xlu0 %v1727_v34, %s3336_s26 }
0x12da   :  { %v1730_v38 = vpop.permute.xlu0 %1729 }
0x12db   :  { %v3677_v15 = vadd.f32 %v1730_v38, %v1722_v36 }
0x12dd   :  { %3290 = vtanh.f32 %v3677_v15 }
0x12e7   :  { %v3291_v39 = vpop.eup %3290 }
0x12e8   :  { %1735 = vrot.lane.b32.xlu1 %v3291_v39, %s3335_s0 }
0x135a   :  { %v1736_v41 = vpop.permute.xlu1 %1735 }
0x135b   :  { %v1738_v43 = vmul.f32 %v1736_v41, %v1721_v32 }
0x135d   :  { %v1819_v45 = vrot.slane %v1738_v43, 2  ;;  %1740 = vrot.lane.b32.xlu0 %v1738_v43, %s3336_s26 }
0x135f   :  { %1820 = vrot.lane.b32.xlu1 %v1819_v45, %s3335_s0 }
0x13cf   :  { %v1741_v46 = vpop.permute.xlu0 %1740 }
0x13d0   :  { %2901 = vmatmul.mubr.msk.f32.vlgmr.msra.gmra.mrb[20].mxu0 %vm144_vm5, %v1741_v46 }
0x13d1   :  { %3203 = vmatpush3.bf16.msra.mxu0 %v3446_v12  ;;  %v1821_v47 = vpop.permute.xlu1 %1820  ;;  %2938 = vmatprep.mubr.msk.f32.mxu0 %vm3332_vm0, %v3333_v1 }
0x13d2   :  { %v1823_v48 = vsel %vm144_vm5, %v1741_v46, %v1821_v47  ;;  %3204 = vmatprep.subr.bf16.mxu0 %v3331_v0 }
0x13d3   :  { %2920 = vmatmul.mubr.msk.f32.vlgmr.msra.gmra.mrb[18].mxu1 %vm324_vm6, %v1823_v48 }
0x13d4   :  { %3215 = vmatpush3.bf16.msra.mxu1 %v3404_v35  ;;  %2957 = vmatprep.mubr.msk.f32.mxu1 %vm3332_vm0, %v3333_v1  ;;  %v1897_v35 = vrot.slane %v1823_v48, 2 }
0x13d5   :  { %3206 = vmatpush3.bf16.msra.mxu0 %v3449_v16  ;;  %3216 = vmatprep.subr.bf16.mxu1 %v3331_v0 }
0x13d6   :  { %3207 = vmatprep.subr.bf16.mxu0 %v3331_v0 }
0x13d8   :  { %3218 = vmatpush3.bf16.msra.mxu1 %v3407_v37 }
0x13d9   :  { %3209 = vmatpush3.bf16.msra.mxu0 %v3453_v19  ;;  %3219 = vmatprep.subr.bf16.mxu1 %v3331_v0 }
0x13da   :  { %3210 = vmatprep.subr.bf16.mxu0 %v3331_v0 }
0x13dc   :  { %3221 = vmatpush3.bf16.msra.mxu1 %v3411_v40 }
0x13dd   :  { %3212 = vmatpush3.bf16.msra.mxu0 %v3459_v25  ;;  %3222 = vmatprep.subr.bf16.mxu1 %v3331_v0 }
0x13de   :  { %3225 = vmatprep.subr.bf16.mxu0 %v3331_v0 }
0x13e0   :  { %2939 = vmatmul.mubr.msk.f32.vlgmr.msra.gmra.mrb[22].mxu0 %vm324_vm6, %v1897_v35  ;;  %3224 = vmatpush3.bf16.msra.mxu1 %v3416_v44 }
0x13e1   :  { %3227 = vmatpush3.bf16.msra.mxu0 %v3446_v12  ;;  %2976 = vmatprep.mubr.msk.f32.mxu0 %vm3332_vm0, %v3333_v1 }
0x13e2   :  { %3228 = vmatprep.subr.bf16.mxu0 %v3331_v0  ;;  %3237 = vmatprep.subr.bf16.mxu1 %v3331_v0 }
0x13e5   :  { %3230 = vmatpush3.bf16.msra.mxu0 %v3449_v16 }
0x13e6   :  { %3231 = vmatprep.subr.bf16.mxu0 %v3331_v0 }
0x13e9   :  { %3233 = vmatpush3.bf16.msra.mxu0 %v3453_v19 }
0x13ea   :  { %3234 = vmatprep.subr.bf16.mxu0 %v3331_v0 }
0x13ed   :  { %3236 = vmatpush3.bf16.msra.mxu0 %v3459_v25 }
0x13ee   :  { %3249 = vmatprep.subr.bf16.mxu0 %v3331_v0 }
0x14a3   :  { %v1810_v37 = vpop.f32.mrb[20].mxu0 }
0x14a4   :  { %v1815_v40 = vrot.slane %v1810_v37, 2  ;;  %v2902_v44 = vpop.f32.mrb[21].mxu0 }
0x14a6   :  { %v1817_v50 = vadd.f32 %v1815_v40, %v3391_v13  ;;  %v1893_v51 = vpop.f32.mrb[18].mxu1 }
0x14a7   :  { %v1894_v52 = vadd.f32 %v3433_v49, %v1893_v51  ;;  %v2921_v53 = vpop.f32.mrb[19].mxu1 }
0x14a8   :  { %v1971_v54 = vrot.slane %v1817_v50, 6 }
0x14a9   :  { %v1974_v55 = vrot.slane %v1894_v52, 6 }
0x14ab   :  { %v1979_v56 = vsel %vm404_vm7, %v1971_v54, %v1974_v55  ;;  %v2289_v54 = vld [vmem:[#allocation2 + $0xc0] sm:$0xff]  ;;  %v2291_v55 = vld [vmem:[#allocation2 + $0xd0] sm:$0xff] }
0x14b3   :  { %v1966_v57 = vpop.f32.mrb[22].mxu0 }
0x14b4   :  { %v1967_v58 = vadd.f32 %v3496_v42, %v1966_v57  ;;  %v2940_v59 = vpop.f32.mrb[23].mxu0  ;;  %v2292_v57 = vld [vmem:[#allocation2 + $0xd8] sm:$0xff] }
0x14b6   :  { %v1977_v60 = vrot.slane %v1967_v58, 4 }
0x14b8   :  { %v1980_v61 = vsel %vm674_vm8, %v1979_v56, %v1977_v60 }
0x14b9   :  { %3292 = vtanh.f32 %v1980_v61 }
0x14c3   :  { %v3293_v62 = vpop.eup %3292 }
0x14c4   :  { %v1982_v63 = vmul.f32 %v3293_v62, %v3396_v22  ;;  %v2407_v62 = vld [vmem:[#allocation2 + $0xe0] ss:$0 sm:$0xff] }
0x14c6   :  { %v1983_v13 = vadd.f32 %v1982_v63, %v3398_v24 }
0x14c8   :  { %1986 = vrot.lane.b32.xlu0 %v1983_v13, %s3335_s0  ;;  %v1984_v4 = vmul.f32 %v1983_v13, %v3677_v15 }
0x153a   :  { %v1987_v2 = vpop.permute.xlu0 %1986 }
0x153b   :  { %v1989_v3 = vmul.f32 %v1987_v2, %v1983_v13 }
0x153d   :  { %1991 = vrot.lane.b32.xlu1 %v1989_v3, %s3336_s26 }
0x15af   :  { %v1992_v6 = vpop.permute.xlu1 %1991 }
0x15b0   :  { %v1994_v5 = vadd.f32 %v1992_v6, %v1984_v4 }
0x15b2   :  { %3294 = vtanh.f32 %v1994_v5  ;;  %v2161_v31 = vrot.slane %v1994_v5, 2 }
0x15bc   :  { %v3295_v10 = vpop.eup %3294 }
0x15bd   :  { %1997 = vrot.lane.b32.xlu0 %v3295_v10, %s3335_s0 }
0x162f   :  { %v1998_v8 = vpop.permute.xlu0 %1997 }
0x1630   :  { %v2000_v7 = vmul.f32 %v1998_v8, %v1983_v13 }
0x1632   :  { %v2005_v9 = vrot.slane %v2000_v7, 2  ;;  %2002 = vrot.lane.b32.xlu1 %v2000_v7, %s3336_s26 }
0x1634   :  { %2006 = vrot.lane.b32.xlu0 %v2005_v9, %s3335_s0 }
0x16a4   :  { %v2003_v11 = vpop.permute.xlu1 %2002 }
0x16a6   :  { %v2007_v14 = vpop.permute.xlu0 %2006 }
0x16a7   :  { %v2009_v17 = vsel %vm144_vm5, %v2003_v11, %v2007_v14 }
0x16a8   :  { %v2083_v18 = vrot.slane %v2009_v17, 2  ;;  %2958 = vmatmul.mubr.msk.f32.vlgmr.msra.gmra.mrb[20].mxu1 %vm324_vm6, %v2009_v17 }
0x16a9   :  { %3239 = vmatpush3.bf16.msra.mxu1 %v3446_v12  ;;  %2995 = vmatprep.mubr.msk.f32.mxu1 %vm3332_vm0, %v3333_v1 }
0x16aa   :  { %2977 = vmatmul.mubr.msk.f32.vlgmr.msra.gmra.mrb[24].mxu0 %vm324_vm6, %v2083_v18  ;;  %3240 = vmatprep.subr.bf16.mxu1 %v3331_v0 }
0x16ab   :  { %3006 = vmatprep.mubr.msk.f32.mxu0 %vm3332_vm0, %v3333_v1 }
0x16ad   :  { %3242 = vmatpush3.bf16.msra.mxu1 %v3449_v16 }
0x16ae   :  { %3243 = vmatprep.subr.bf16.mxu1 %v3331_v0 }
0x16b1   :  { %3245 = vmatpush3.bf16.msra.mxu1 %v3453_v19 }
0x16b2   :  { %3246 = vmatprep.subr.bf16.mxu1 %v3331_v0 }
0x16b5   :  { %3248 = vmatpush3.bf16.msra.mxu1 %v3459_v25 }
0x177b   :  { %v2079_v12 = vpop.f32.mrb[20].mxu1 }
0x177c   :  { %v2959_v20 = vpop.f32.mrb[21].mxu1  ;;  %v2080_v27 = vadd.f32 %v3433_v49, %v2079_v12 }
0x177d   :  { %v2152_v21 = vpop.f32.mrb[24].mxu0 }
0x177e   :  { %v2153_v23 = vadd.f32 %v3496_v42, %v2152_v21  ;;  %v2978_v26 = vpop.f32.mrb[25].mxu0 }
0x1780   :  { %v2157_v28 = vrot.slane %v2153_v23, 6 }
0x1782   :  { %v2159_v1 = vsel %vm404_vm7, %v2080_v27, %v2157_v28 }
0x1783   :  { %3296 = vtanh.f32 %v2159_v1 }
0x178d   :  { %v3297_v16 = vpop.eup %3296 }
0x178e   :  { %v2164_v29 = vmul.f32 %v3297_v16, %v3396_v22 }
0x1790   :  { %v2165_v19 = vadd.f32 %v2164_v29, %v3398_v24 }
0x1792   :  { %2168 = vrot.lane.b32.xlu1 %v2165_v19, %s3335_s0  ;;  %v2166_v32 = vmul.f32 %v2165_v19, %v2161_v31 }
0x1804   :  { %v2169_v25 = vpop.permute.xlu1 %2168 }
0x1805   :  { %v2171_v30 = vmul.f32 %v2169_v25, %v2165_v19 }
0x1807   :  { %2173 = vrot.lane.b32.xlu0 %v2171_v30, %s3336_s26 }
0x1879   :  { %v2174_v33 = vpop.permute.xlu0 %2173 }
0x187a   :  { %v2176_v34 = vadd.f32 %v2174_v33, %v2166_v32 }
0x187c   :  { %3298 = vtanh.f32 %v2176_v34  ;;  %v2269_v50 = vrot.slane %v2176_v34, 2 }
0x1886   :  { %v3299_v49 = vpop.eup %3298 }
0x1887   :  { %2179 = vrot.lane.b32.xlu1 %v3299_v49, %s3335_s0 }
0x18f9   :  { %v2180_v36 = vpop.permute.xlu1 %2179 }
0x18fa   :  { %v2182_v38 = vmul.f32 %v2180_v36, %v2165_v19 }
0x18fc   :  { %v2187_v15 = vrot.slane %v2182_v38, 2  ;;  %2184 = vrot.lane.b32.xlu0 %v2182_v38, %s3336_s26 }
0x18fe   :  { %2188 = vrot.lane.b32.xlu1 %v2187_v15, %s3335_s0 }
0x196e   :  { %v2185_v39 = vpop.permute.xlu0 %2184 }
0x1970   :  { %v2189_v41 = vpop.permute.xlu1 %2188 }
0x1971   :  { %v2191_v43 = vsel %vm144_vm5, %v2185_v39, %v2189_v41 }
0x1972   :  { %2996 = vmatmul.mubr.msk.f32.vlgmr.msra.gmra.mrb[22].mxu1 %vm324_vm6, %v2191_v43 }
0x1a45   :  { %v2261_v45 = vpop.f32.mrb[22].mxu1 }
0x1a46   :  { %v2262_v46 = vadd.f32 %v3496_v42, %v2261_v45  ;;  %v2997_v47 = vpop.f32.mrb[23].mxu1  ;;  %v2290_v42 = vld [vmem:[#allocation2 + $0xc8] sm:$0xff] }
0x1a47   :  { %v3250_v56 = vpack.c.bf16 %v2290_v42, %v2289_v54 }
0x1a48   :  { %3300 = vtanh.f32 %v2262_v46 }
0x1a49   :  { %3251 = vmatpush3.bf16.msra.mxu0 %v3250_v56 }
0x1a4a   :  { %3252 = vmatprep.subr.bf16.mxu0 %v3331_v0 }
0x1a52   :  { %v3301_v48 = vpop.eup %3300 }
0x1a53   :  { %v2266_v35 = vmul.f32 %v3301_v48, %v3396_v22  ;;  %v3253_v22 = vpack.c.bf16 %v2292_v57, %v2291_v55 }
0x1a55   :  { %v2267_v37 = vadd.f32 %v2266_v35, %v3398_v24  ;;  %3254 = vmatpush3.bf16.msra.mxu0 %v3253_v22 }
0x1a57   :  { %2273 = vrot.lane.b32.xlu0 %v2267_v37, %s3335_s0  ;;  %v2271_v51 = vmul.f32 %v2269_v50, %v2267_v37 }
0x1ac9   :  { %v2274_v40 = vpop.permute.xlu0 %2273 }
0x1aca   :  { %v2276_v44 = vmul.f32 %v2274_v40, %v2267_v37 }
0x1acc   :  { %2278 = vrot.lane.b32.xlu1 %v2276_v44, %s3336_s26 }
0x1b3e   :  { %v2279_v52 = vpop.permute.xlu1 %2278 }
0x1b3f   :  { %v2281_v53 = vadd.f32 %v2279_v52, %v2271_v51 }
0x1b41   :  { %3302 = vtanh.f32 %v2281_v53 }
0x1b4b   :  { %v3303_v24 = vpop.eup %3302 }
0x1b4c   :  { %2284 = vrot.lane.b32.xlu0 %v3303_v24, %s3335_s0 }
0x1bbe   :  { %v2285_v58 = vpop.permute.xlu0 %2284 }
0x1bbf   :  { %v2287_v59 = vmul.f32 %v2285_v58, %v2267_v37 }
0x1bc1   :  { %v2288_v60 = vsel %vm404_vm7, %v2287_v59, 0.0 }
0x1bc2   :  { %2299 = vrot.lane.b32.xlu1 %v2288_v60, %s3336_s26 }
0x1c34   :  { %v2300_v61 = vpop.permute.xlu1 %2299 }
0x1c35   :  { %3007 = vmatmul.mubr.msk.f32.vlgmr.msra.gmra.mrb[26].mxu0 %vm144_vm5, %v2300_v61 }
0x1d08   :  { %v2369_v63 = vpop.f32.mrb[26].mxu0 }
0x1d09   :  { %v2370_v13 = vadd.f32 %v2407_v62, %v2369_v63  ;;  %v3008_v2 = vpop.f32.mrb[27].mxu0 }
0x1d0b   :  { %2373 = vst [vmem:[%s3771_s2] sm:$0xff] %v2370_v13 }
0x1d0c   :  { %2378 = vsyncpa [#allocation3], 1 }

</bundles_post_ra>
